<compile_context>
chip_gen: v7x
topology: tpu7x:2x2x1
jax: 0.10.0
libtpu: 0.0.40
codegen_flags: <defaults>
</compile_context>

<pallas_src>
import math

import jax
import jax.numpy as jnp
from jax import lax
from jax.experimental import pallas as pl
from jax.experimental.pallas import tpu as pltpu

ALPHA = 0.5   # kernel_args for the 'exp' kernel: kappa(x) = exp(alpha * (x - 1))
EPS = 1e-6
LANE = 128


def _round_up(x, m):
  return ((x + m - 1) // m) * m


# ---------------------------------------------------------------------------
# Pallas kernel: one tile (npt consecutive start nodes) of one PathLayer
# ---------------------------------------------------------------------------
def _path_layer_kernel(idx_ref, feat_ref, wt_ref, lin_ref, out_ref):
  """idx_ref : (tm, K)    int32  path node indices (tm = npt * paths_per_node)
     feat_ref: (N, Dp)    f32    all node features, VMEM resident (lane-padded)
     wt_ref  : (K*Dp, Hp) bf16   alpha * Z^T, per-position blocks, lane-padded
     lin_ref : (Hp, Hp)   f32    (exp(-alpha)/paths_per_node) * lintrans, zero-embedded
     out_ref : (npt, Hp)  f32    node embeddings for this tile's npt nodes
  """
  tm, path_size = idx_ref.shape
  num_nodes, d_pad = feat_ref.shape
  h_pad = wt_ref.shape[1]
  npt = out_ref.shape[0]
  ppn = tm // npt                       # paths per node (uniform, grouped)

  idx = idx_ref[...]                    # (tm, K)
  feat = feat_ref[...]                  # (N, Dp) f32
  col = lax.broadcasted_iota(jnp.int32, (tm, num_nodes), 1)

  s = jnp.zeros((tm, h_pad), jnp.float32)
  ss = jnp.zeros((tm, 1), jnp.float32)
  for k in range(path_size):            # static unroll, path_size is small
    # in-kernel gather of position-k node of every path: one-hot @ features.
    onehot = (idx[:, k:k + 1] == col).astype(jnp.float32)            # (tm, N)
    g = jnp.dot(onehot, feat, preferred_element_type=jnp.float32)    # exact gather
    ss = ss + jnp.sum(g * g, axis=-1, keepdims=True)                 # f32 norms
    s = s + jnp.dot(g.astype(jnp.bfloat16),                          # bf16 MXU
                    wt_ref[k * d_pad:(k + 1) * d_pad, :],
                    preferred_element_type=jnp.float32)              # alpha folded in

  inv_norm = lax.rsqrt(jnp.maximum(ss, EPS * EPS))   # EUP rsqrt (no sqrt+div)
  norms = ss * inv_norm                              # = ||phi0(p)||
  pemb = norms * jnp.exp(s * inv_norm)               # exp kernel (exp(-alpha) folded in lin)

  # segment-sum pooling over the ppn consecutive paths of each of the npt
  # nodes; selector is built in-register (no HBM pooling matrix, no (N,tm) DMA).
  row = lax.broadcasted_iota(jnp.int32, (npt, tm), 0)
  colp = lax.broadcasted_iota(jnp.int32, (npt, tm), 1)
  seg = ((colp >= row * ppn) & (colp < (row + 1) * ppn)).astype(jnp.float32)
  pooled = jnp.dot(seg, pemb, preferred_element_type=jnp.float32)    # (npt, Hp)

  # mean (1/ppn) and lintrans fused: lin_ref already carries exp(-alpha)/ppn.
  out_ref[...] = jnp.dot(pooled, lin_ref[...],
                         preferred_element_type=jnp.float32)


# ---------------------------------------------------------------------------
# Wrappers (glue: parameter prep / padding, lintrans eigendecomposition)
# ---------------------------------------------------------------------------
def _choose_nodes_per_tile(n_nodes, paths_per_node, max_paths_per_tile):
  """Largest nodes-per-tile that divides N, keeps the output block sublane
  aligned (multiple of 8 or the full node dim) and respects the path budget."""
  cand = max(1, min(n_nodes, max_paths_per_tile // max(paths_per_node, 1)))
  for npt in range(cand, 0, -1):
    if n_nodes % npt == 0 and (npt % 8 == 0 or npt == n_nodes):
      return npt
  return n_nodes


def path_layer_forward(features_padded, paths_indices, weight, lintrans, *,
                       paths_per_node, alpha=ALPHA, max_paths_per_tile=1024):
  """features_padded: (N, Dp) f32 (channels zero-padded to a 128 multiple);
  paths_indices: (M, K) int32 grouped by start node, paths_per_node each;
  weight: (H, K, D); lintrans: (H, H).  Returns (N, Hp) f32 node embeddings."""
  N, Dp = features_padded.shape
  M, K = paths_indices.shape
  H, Kw, D = weight.shape
  assert Kw == K and Dp == _round_up(D, LANE)
  assert M == N * paths_per_node, "paths must be grouped per start node"
  Hp = _round_up(H, LANE)

  # parameter prep (glue): fold alpha into the filters, exp(-alpha) and the
  # 1/paths_per_node mean normalization into lintrans; lane-pad with zeros.
  w_t = jnp.transpose(weight, (1, 2, 0))                         # (K, D, H)
  w_t = jnp.pad(w_t, ((0, 0), (0, Dp - D), (0, Hp - H)))
  wt = (alpha * w_t).reshape(K * Dp, Hp).astype(jnp.bfloat16)    # bf16 MXU input
  lin_eff = jnp.pad(lintrans * (math.exp(-alpha) / paths_per_node),
                    ((0, Hp - H), (0, Hp - H)))                  # zero-embedded

  npt = _choose_nodes_per_tile(N, paths_per_node, max_paths_per_tile)
  tm = npt * paths_per_node
  grid = (N // npt,)

  return pl.pallas_call(
      _path_layer_kernel,
      out_shape=jax.ShapeDtypeStruct((N, Hp), jnp.float32),
      grid_spec=pltpu.PrefetchScalarGridSpec(
          num_scalar_prefetch=0,
          grid=grid,
          in_specs=[
              pl.BlockSpec((tm, K), lambda i: (i, 0)),          # path indices tile
              pl.BlockSpec((N, Dp), lambda i: (0, 0)),          # features, VMEM resident
              pl.BlockSpec((K * Dp, Hp), lambda i: (0, 0)),     # filters (bf16, alpha folded)
              pl.BlockSpec((Hp, Hp), lambda i: (0, 0)),         # lintrans (scaled, zero-embedded)
          ],
          out_specs=pl.BlockSpec((npt, Hp), lambda i: (i, 0)),  # disjoint node rows
      ),
      compiler_params=pltpu.CompilerParams(
          dimension_semantics=("parallel",)),                   # megacore-friendly
  )(paths_indices, features_padded, wt, lin_eff)


def kappa(x, alpha):
  return jnp.exp(alpha * (x - 1.0))


def compute_lintrans(weight, alpha):
  """lintrans = kappa(Z Z^T)^{-1/2}, computed from the UNPADDED filters."""
  # TODO(synk): eigendecomposition has no clean Pallas equivalent; this is a
  # parameter-only precompute so it stays in plain JAX.
  H = weight.shape[0]
  w = weight.reshape(H, -1)
  gram = kappa(w @ w.T, alpha)
  evals, evecs = jnp.linalg.eigh(gram)
  evals = jnp.maximum(evals, 1e-6)
  return (evecs * (evals ** -0.5)) @ evecs.T


class PathSequentialPallas:
  """Mirror of PathSequential.forward (kernel='exp', pooling='mean',
  aggregation=False, encode_edges=False)."""

  def __init__(self, input_size, hidden_sizes, path_sizes, key, kernel_args=ALPHA):
    self.input_size = input_size
    self.hidden_sizes = hidden_sizes
    self.path_sizes = path_sizes
    self.alpha = kernel_args
    self.weights = []
    in_sz = input_size
    for h, k in zip(hidden_sizes, path_sizes):
      key, sub = jax.random.split(key)
      w = jax.random.normal(sub, (h, k, in_sz), jnp.float32)
      # spherical filters (unit norm over path_size*input_size), as in CKN init
      w = w / jnp.maximum(
          jnp.linalg.norm(w.reshape(h, -1), axis=-1, keepdims=True), EPS
      ).reshape(h, 1, 1)
      self.weights.append(w)
      in_sz = h
    self.lintrans = [compute_lintrans(w, self.alpha) for w in self.weights]
    self.output_size = hidden_sizes[-1]     # aggregation=False

  def __call__(self, features, paths_indices, paths_per_node,
               max_paths_per_tile=1024):
    # TODO(synk): variable per-node path counts (other_info['n_paths']),
    # aggregation=True and edge encoding are not implemented; paths must be
    # grouped by start node with a uniform paths_per_node.
    N, D = features.shape
    out = jnp.pad(features.astype(jnp.float32),
                  ((0, 0), (0, _round_up(D, LANE) - D)))
    for w, lt in zip(self.weights, self.lintrans):
      out = path_layer_forward(out, paths_indices, w, lt,
                               paths_per_node=paths_per_node,
                               alpha=self.alpha,
                               max_paths_per_tile=max_paths_per_tile)
    return out[:, :self.output_size], None   # (output, output_edges)


# ---------------------------------------------------------------------------
# Pure-JAX reference (for correctness check)
# ---------------------------------------------------------------------------
def reference_forward(model, features, paths_indices, paths_per_node):
  out = features
  N = features.shape[0]
  M, K = paths_indices.shape
  for w, lt in zip(model.weights, model.lintrans):
    H = w.shape[0]
    D = out.shape[1]
    emb = out[paths_indices.reshape(-1)].reshape(M, K * D)
    norms = jnp.linalg.norm(emb, axis=-1, keepdims=True)
    embn = emb / jnp.maximum(norms, EPS)
    s = jnp.einsum('mk,hk->mh', embn, w.reshape(H, K * D), precision='highest')
    pemb = norms * jnp.exp(model.alpha * (s - 1.0))
    node = jnp.mean(pemb.reshape(N, paths_per_node, H), axis=1)
    out = jnp.einsum('nh,hg->ng', node, lt, precision='highest')
  return out


# ---------------------------------------------------------------------------
if __name__ == "__main__":
  key = jax.random.PRNGKey(0)

  # small synthetic problem
  G = 2                      # graphs (paths stay inside their graph)
  NODES_PER_GRAPH = 8
  N = G * NODES_PER_GRAPH    # 16 nodes total
  D = 8                      # input_size
  HIDDEN_SIZES = [32, 32]
  PATH_SIZES = [3, 3]
  K = PATH_SIZES[0]
  PATHS_PER_NODE = 16
  M = N * PATHS_PER_NODE     # 256 paths total

  k_feat, k_path, k_model = jax.random.split(key, 3)

  features = jax.random.normal(k_feat, (N, D), jnp.float32)

  # each node owns PATHS_PER_NODE consecutive paths; path = (start, r1, r2)
  # confined to the start node's graph (mirrors gckn path extraction).
  start = jnp.repeat(jnp.arange(N, dtype=jnp.int32), PATHS_PER_NODE)      # (M,)
  graph_of = start // NODES_PER_GRAPH
  rest = jax.random.randint(k_path, (M, K - 1), 0, NODES_PER_GRAPH,
                            dtype=jnp.int32) + (graph_of * NODES_PER_GRAPH)[:, None]
  paths_indices = jnp.concatenate([start[:, None], rest], axis=1)         # (M, K)

  model = PathSequentialPallas(D, HIDDEN_SIZES, PATH_SIZES, k_model)

  # max_paths_per_tile=128 -> two node tiles of 8 nodes (128 paths) each, so
  # the multi-step "parallel" grid path is exercised.
  out, out_edges = model(features, paths_indices, PATHS_PER_NODE,
                         max_paths_per_tile=128)
  out = jax.block_until_ready(out)

  ref = reference_forward(model, features, paths_indices, PATHS_PER_NODE)
  assert out.shape == (N, model.output_size), out.shape
  assert out_edges is None
  max_diff = jnp.max(jnp.abs(out - ref))
  assert jnp.allclose(out, ref, rtol=1e-2, atol=1e-2), \
      f"max abs diff {max_diff}"

  print("KERNEL_OK")
</pallas_src>

<mosaic_0001>
module attributes {stable_mosaic.version = 11 : i64} {
  func.func @_path_layer_kernel(%arg0: i32, %arg1: memref<128x3xi32, #tpu.memory_space<vmem>>, %arg2: memref<16x128xf32, #tpu.memory_space<vmem>>, %arg3: memref<384x128xbf16, #tpu.memory_space<vmem>>, %arg4: memref<128x128xf32, #tpu.memory_space<vmem>>, %arg5: memref<8x128xf32, #tpu.memory_space<vmem>>) attributes {dimension_semantics = [#tpu.dimension_semantics<parallel>], iteration_bounds = array<i64: 2>, scalar_prefetch = 0 : i64, scratch_operands = 0 : i64, tpu.core_type = #tpu.core_type<tc>, window_params = [{transform_indices = @transform_0, window_bounds = array<i64: 128, 3>}, {pipeline_mode = #tpu.pipeline_mode<synchronous>, transform_indices = @transform_1, window_bounds = array<i64: 16, 128>}, {pipeline_mode = #tpu.pipeline_mode<synchronous>, transform_indices = @transform_2, window_bounds = array<i64: 384, 128>}, {pipeline_mode = #tpu.pipeline_mode<synchronous>, transform_indices = @transform_3, window_bounds = array<i64: 128, 128>}, {transform_indices = @transform_4, window_bounds = array<i64: 8, 128>}]} {
    %c0 = arith.constant 0 : index
    %c0_0 = arith.constant 0 : index
    %0 = vector.load %arg1[%c0, %c0_0] : memref<128x3xi32, #tpu.memory_space<vmem>>, vector<128x3xi32>
    %c0_1 = arith.constant 0 : index
    %c0_2 = arith.constant 0 : index
    %1 = vector.load %arg2[%c0_1, %c0_2] : memref<16x128xf32, #tpu.memory_space<vmem>>, vector<16x128xf32>
    %2 = tpu.iota {dimensions = array<i32: 1>} : vector<128x16xi32>
    %cst = arith.constant 0.000000e+00 : f32
    %3 = vector.broadcast %cst : f32 to vector<128x128xf32>
    %cst_3 = arith.constant 0.000000e+00 : f32
    %4 = vector.broadcast %cst_3 : f32 to vector<128x1xf32>
    %5 = vector.extract_strided_slice %0 {offsets = [0, 0], sizes = [128, 1], strides = [1, 1]} : vector<128x3xi32> to vector<128x1xi32>
    %6 = vector.broadcast %5 : vector<128x1xi32> to vector<128x16xi32>
    %7 = arith.cmpi eq, %6, %2 : vector<128x16xi32>
    %8 = arith.extui %7 : vector<128x16xi1> to vector<128x16xi32>
    %9 = arith.sitofp %8 : vector<128x16xi32> to vector<128x16xf32>
    %cst_4 = arith.constant dense<0.000000e+00> : vector<128x128xf32>
    %10 = tpu.matmul %9, %1, %cst_4 {dimension_numbers = #tpu.dot_dimension_numbers<[1], [0], [0], [1], [0, 0, 1, 1], [], []>} : vector<128x16xf32>, vector<16x128xf32>, vector<128x128xf32> -> vector<128x128xf32>
    %11 = arith.mulf %10, %10 : vector<128x128xf32>
    %cst_5 = arith.constant dense<0.000000e+00> : vector<128xf32>
    %12 = vector.multi_reduction <add>, %11, %cst_5 [1] : vector<128x128xf32> to vector<128xf32>
    %13 = vector.shape_cast %12 : vector<128xf32> to vector<128x1xf32>
    %14 = arith.addf %4, %13 : vector<128x1xf32>
    %15 = arith.truncf %10 : vector<128x128xf32> to vector<128x128xbf16>
    %c0_6 = arith.constant 0 : index
    %c0_7 = arith.constant 0 : index
    %16 = vector.load %arg3[%c0_6, %c0_7] : memref<384x128xbf16, #tpu.memory_space<vmem>>, vector<128x128xbf16>
    %cst_8 = arith.constant dense<0.000000e+00> : vector<128x128xf32>
    %17 = tpu.matmul %15, %16, %cst_8 {dimension_numbers = #tpu.dot_dimension_numbers<[1], [0], [0], [1], [0, 0, 1, 1], [], []>} : vector<128x128xbf16>, vector<128x128xbf16>, vector<128x128xf32> -> vector<128x128xf32>
    %18 = arith.addf %3, %17 : vector<128x128xf32>
    %19 = vector.extract_strided_slice %0 {offsets = [0, 1], sizes = [128, 1], strides = [1, 1]} : vector<128x3xi32> to vector<128x1xi32>
    %20 = vector.broadcast %19 : vector<128x1xi32> to vector<128x16xi32>
    %21 = arith.cmpi eq, %20, %2 : vector<128x16xi32>
    %22 = arith.extui %21 : vector<128x16xi1> to vector<128x16xi32>
    %23 = arith.sitofp %22 : vector<128x16xi32> to vector<128x16xf32>
    %cst_9 = arith.constant dense<0.000000e+00> : vector<128x128xf32>
    %24 = tpu.matmul %23, %1, %cst_9 {dimension_numbers = #tpu.dot_dimension_numbers<[1], [0], [0], [1], [0, 0, 1, 1], [], []>} : vector<128x16xf32>, vector<16x128xf32>, vector<128x128xf32> -> vector<128x128xf32>
    %25 = arith.mulf %24, %24 : vector<128x128xf32>
    %cst_10 = arith.constant dense<0.000000e+00> : vector<128xf32>
    %26 = vector.multi_reduction <add>, %25, %cst_10 [1] : vector<128x128xf32> to vector<128xf32>
    %27 = vector.shape_cast %26 : vector<128xf32> to vector<128x1xf32>
    %28 = arith.addf %14, %27 : vector<128x1xf32>
    %29 = arith.truncf %24 : vector<128x128xf32> to vector<128x128xbf16>
    %c128 = arith.constant 128 : index
    %c0_11 = arith.constant 0 : index
    %30 = vector.load %arg3[%c128, %c0_11] : memref<384x128xbf16, #tpu.memory_space<vmem>>, vector<128x128xbf16>
    %cst_12 = arith.constant dense<0.000000e+00> : vector<128x128xf32>
    %31 = tpu.matmul %29, %30, %cst_12 {dimension_numbers = #tpu.dot_dimension_numbers<[1], [0], [0], [1], [0, 0, 1, 1], [], []>} : vector<128x128xbf16>, vector<128x128xbf16>, vector<128x128xf32> -> vector<128x128xf32>
    %32 = arith.addf %18, %31 : vector<128x128xf32>
    %33 = vector.extract_strided_slice %0 {offsets = [0, 2], sizes = [128, 1], strides = [1, 1]} : vector<128x3xi32> to vector<128x1xi32>
    %34 = vector.broadcast %33 : vector<128x1xi32> to vector<128x16xi32>
    %35 = arith.cmpi eq, %34, %2 : vector<128x16xi32>
    %36 = arith.extui %35 : vector<128x16xi1> to vector<128x16xi32>
    %37 = arith.sitofp %36 : vector<128x16xi32> to vector<128x16xf32>
    %cst_13 = arith.constant dense<0.000000e+00> : vector<128x128xf32>
    %38 = tpu.matmul %37, %1, %cst_13 {dimension_numbers = #tpu.dot_dimension_numbers<[1], [0], [0], [1], [0, 0, 1, 1], [], []>} : vector<128x16xf32>, vector<16x128xf32>, vector<128x128xf32> -> vector<128x128xf32>
    %39 = arith.mulf %38, %38 : vector<128x128xf32>
    %cst_14 = arith.constant dense<0.000000e+00> : vector<128xf32>
    %40 = vector.multi_reduction <add>, %39, %cst_14 [1] : vector<128x128xf32> to vector<128xf32>
    %41 = vector.shape_cast %40 : vector<128xf32> to vector<128x1xf32>
    %42 = arith.addf %28, %41 : vector<128x1xf32>
    %43 = arith.truncf %38 : vector<128x128xf32> to vector<128x128xbf16>
    %c256 = arith.constant 256 : index
    %c0_15 = arith.constant 0 : index
    %44 = vector.load %arg3[%c256, %c0_15] : memref<384x128xbf16, #tpu.memory_space<vmem>>, vector<128x128xbf16>
    %cst_16 = arith.constant dense<0.000000e+00> : vector<128x128xf32>
    %45 = tpu.matmul %43, %44, %cst_16 {dimension_numbers = #tpu.dot_dimension_numbers<[1], [0], [0], [1], [0, 0, 1, 1], [], []>} : vector<128x128xbf16>, vector<128x128xbf16>, vector<128x128xf32> -> vector<128x128xf32>
    %46 = arith.addf %32, %45 : vector<128x128xf32>
    %cst_17 = arith.constant 9.99999996E-13 : f32
    %47 = vector.broadcast %cst_17 : f32 to vector<128x1xf32>
    %48 = arith.maximumf %42, %47 : vector<128x1xf32>
    %49 = math.rsqrt %48 : vector<128x1xf32>
    %50 = arith.mulf %42, %49 : vector<128x1xf32>
    %51 = vector.broadcast %49 : vector<128x1xf32> to vector<128x128xf32>
    %52 = arith.mulf %46, %51 : vector<128x128xf32>
    %53 = math.exp %52 : vector<128x128xf32>
    %54 = vector.broadcast %50 : vector<128x1xf32> to vector<128x128xf32>
    %55 = arith.mulf %54, %53 : vector<128x128xf32>
    %56 = tpu.iota {dimensions = array<i32: 0>} : vector<8x128xi32>
    %57 = tpu.iota {dimensions = array<i32: 1>} : vector<8x128xi32>
    %c16_i32 = arith.constant 16 : i32
    %58 = vector.broadcast %c16_i32 : i32 to vector<8x128xi32>
    %59 = arith.muli %56, %58 : vector<8x128xi32>
    %60 = arith.cmpi sge, %57, %59 : vector<8x128xi32>
    %c1_i32 = arith.constant 1 : i32
    %61 = vector.broadcast %c1_i32 : i32 to vector<8x128xi32>
    %62 = arith.addi %56, %61 : vector<8x128xi32>
    %c16_i32_18 = arith.constant 16 : i32
    %63 = vector.broadcast %c16_i32_18 : i32 to vector<8x128xi32>
    %64 = arith.muli %62, %63 : vector<8x128xi32>
    %65 = arith.cmpi slt, %57, %64 : vector<8x128xi32>
    %66 = arith.andi %60, %65 : vector<8x128xi1>
    %67 = arith.extui %66 : vector<8x128xi1> to vector<8x128xi32>
    %68 = arith.sitofp %67 : vector<8x128xi32> to vector<8x128xf32>
    %cst_19 = arith.constant dense<0.000000e+00> : vector<8x128xf32>
    %69 = tpu.matmul %68, %55, %cst_19 {dimension_numbers = #tpu.dot_dimension_numbers<[1], [0], [0], [1], [0, 0, 1, 1], [], []>} : vector<8x128xf32>, vector<128x128xf32>, vector<8x128xf32> -> vector<8x128xf32>
    %c0_20 = arith.constant 0 : index
    %c0_21 = arith.constant 0 : index
    %70 = vector.load %arg4[%c0_20, %c0_21] : memref<128x128xf32, #tpu.memory_space<vmem>>, vector<128x128xf32>
    %cst_22 = arith.constant dense<0.000000e+00> : vector<8x128xf32>
    %71 = tpu.matmul %69, %70, %cst_22 {dimension_numbers = #tpu.dot_dimension_numbers<[1], [0], [0], [1], [0, 0, 1, 1], [], []>} : vector<8x128xf32>, vector<128x128xf32>, vector<8x128xf32> -> vector<8x128xf32>
    %c0_23 = arith.constant 0 : index
    %c0_24 = arith.constant 0 : index
    %72 = vector.load %arg5[%c0_23, %c0_24] : memref<8x128xf32, #tpu.memory_space<vmem>>, vector<8x128xf32>
    tpu.vector_store %arg5[%c0_23, %c0_24], %71 {strides = array<i32>} : memref<8x128xf32, #tpu.memory_space<vmem>>, vector<8x128xf32>,
    return
  }
  func.func @transform_0(%arg0: i32) -> (i32, i32) {
    %c0_i32 = arith.constant 0 : i32
    %c0_i32_0 = arith.constant 0 : i32
    return %arg0, %c0_i32 : i32, i32
  }
  func.func @transform_1(%arg0: i32) -> (i32, i32) {
    %c0_i32 = arith.constant 0 : i32
    %c0_i32_0 = arith.constant 0 : i32
    %c0_i32_1 = arith.constant 0 : i32
    return %c0_i32, %c0_i32_0 : i32, i32
  }
  func.func @transform_2(%arg0: i32) -> (i32, i32) {
    %c0_i32 = arith.constant 0 : i32
    %c0_i32_0 = arith.constant 0 : i32
    %c0_i32_1 = arith.constant 0 : i32
    return %c0_i32, %c0_i32_0 : i32, i32
  }
  func.func @transform_3(%arg0: i32) -> (i32, i32) {
    %c0_i32 = arith.constant 0 : i32
    %c0_i32_0 = arith.constant 0 : i32
    %c0_i32_1 = arith.constant 0 : i32
    return %c0_i32, %c0_i32_0 : i32, i32
  }
  func.func @transform_4(%arg0: i32) -> (i32, i32) {
    %c0_i32 = arith.constant 0 : i32
    %c0_i32_0 = arith.constant 0 : i32
    return %arg0, %c0_i32 : i32, i32
  }
}

</mosaic_0001>

<bundles_post_ra>
// kernel: tpu_custom_call.1
= control target key start
LH: loop header
LB: loop body
LE: loop exit
PB: predicated region body
PF: predicated region fallthrough
CT: control target
= control target key end

     0   :  { %9 = vsyncpa [#allocation3], 0  ;;  %s3703_s0 = inlined_call_operand.vmem [shape: s32[256,3], index: 0, kind: input, shape index: {}]   ;;  %s3704_s1 = inlined_call_operand.vmem [shape: f32[16,128], index: 1, kind: input, shape index: {}]   ;;  %s3705_s2 = inlined_call_operand.vmem [shape: bf16[384,128], index: 2, kind: input, shape index: {}]   ;;  %s3706_s3 = inlined_call_operand.hbm [shape: f32[128,128], index: 3, kind: input, shape index: {}]   ;;  %s3707_s4 = inlined_call_operand.hbm [shape: f32[16,128], index: 4, kind: output, shape index: {}]  }
   0x1   :  { %10 = vsyncpa [#allocation4], 0 }
   0x2   :  { %12 = vsyncpa [#allocation4 + $0x1], 0  ;;  %s3079_s15 = smov 0   ;;  %s3081_s16 = smov 0  }
   0x3   :  { %s3083_s17 = smov 0   ;;  %s3085_s18 = smov 0  }
   0x4 LB: > { %s3100_s19 = sadd.s32 4294967295, %s3041_s18   ;;  %s2181_s20 = sadd.s32 4294967294, %s3041_s18   ;;  %s3041_s18 = sphi %s3085_s18, %s3723_s18   ;;  %s3037_s17 = sphi %s3083_s17, %s3722_s17   ;;  %s3033_s16 = sphi %s3081_s16, %s3721_s16   ;;  %s3029_s15 = sphi %s3079_s15, %s3720_s15  }
   0x5   : > { %s3104_s21 = sadd.s32 1, %s3041_s18   ;;  %s114_s22 = sadd.s32 1, %s3037_s17 }
   0x6   : > { %s111_s23 = ssub.s32 %s3041_s18, %s3104_s21  ;;  %p124_p0 = scmp.ne.s32.totalorder %s3037_s17, %s3033_s16 }
   0x7   : > { %p112_p1 = scmp.eq.s32.totalorder %s111_s23, 0  ;;  %p125_p2 = scmp.eq.s32.totalorder %s3100_s19, 1 }
   0x8   : > { %p130_p3 = scmp.ne.s32.totalorder %s3033_s16, %s3029_s15  ;;  %p131_p4 = scmp.eq.s32.totalorder %s2181_s20, 1 }
   0x9   : > { %s3115_s24 = scalar_select %p112_p1, %s3037_s17, %s114_s22  }
   0xa   : > { %p3117_p5 = por %p125_p2, %p124_p0  ;;  %p3121_p6 = por %p131_p4, %p130_p3 }
   0xb   : > { %p2182_p7 = scmp.ge.s32.totalorder %s3041_s18, 1  ;;  %p138_p8 = scmp.lt.s32.totalorder %s3041_s18, 3 }
   0xc   : > { %s3711_s25 = scalar_select %p3117_p5, 1, 0 }
   0xd   : > { %s3712_s26 = scalar_select %p3121_p6, 1, 0 }
   0xe   : > { %p3708_p9 = scmp.eq.s32.totalorder %s3100_s19, 0  ;;  %p3128_p10 = pnand %p2182_p7, %p138_p8 }
   0xf   : > { %s3043_s28 = smov [#allocation2]   ;;  %s2947_s7 = scalar_lea.hbm %s3706_s3, 2048 }
  0x10   : > { %s3713_s27 = scalar_select %p3128_p10, 1, 0 }
  0x11   : > { %s156_s29 = sshll.u32 %s3043_s28, 4  ;;  %p2800_p11 = pneg %p3128_p10  ;;  %s157_s29 = int_to_ptr.vmem [resolvable:$true] %s156_s29 }
  0x12   : > { %p2948_p13 = scmp.ne.s32.totalorder %s3706_s3, %s2947_s7  ;;  %p2954_p3 = scmp.lt.u32.totalorder %s2947_s7, %s3706_s3 }
  0x13   : > { %p3136_p12 = pnand %p3708_p9, %p2800_p11 }
  0x15   : > { %p2949_p0 = pneg %p3136_p12 }
  0x17   : > { %p2950_p1 = pnand %p2949_p0, %p2948_p13 }
  0x19   : > { %p2951_p2 = pneg %p2950_p1 }
  0x1b   : > { %p2956_p4 = pnand %p2954_p3, %p2951_p2 }
  0x1d   : > { %2959 = shalt.err (!%p2956_p4)
}
  0x1e   : > { %s2960_s12 = scalar_lea.vmem %s157_s29, 2048  ;;  %p2968_p9 = scmp.lt.s32.totalorder %s157_s29, %s157_s29 }
  0x1f   : > { %p2961_p7 = scmp.ne.s32.totalorder %s157_s29, %s2960_s12  ;;  %p2969_p6 = scmp.lt.s32.totalorder %s2960_s12, %s2960_s12 }
  0x21   : > { %p2963_p8 = pnand %p2961_p7, %p2949_p0  ;;  %p2970_p5 = por %p2969_p6, %p2968_p9 }
  0x23   : > { %p2964_p11 = pneg %p2963_p8 }
  0x25   : > { %p2971_p10 = pnand %p2970_p5, %p2964_p11 }
  0x27   : > { %2974 = shalt.err (!%p2971_p10)
}
  0x28   : > { %s3044_s13 = smov 128   ;;  %s3045_s14 = smov 8  }
  0x29   : > { %2803 = dma.hbm_to_vmem [thread:$0]  (!%p3136_p12), %s3706_s3, 2048, %s157_s29, [#allocation3], %s3044_s13, %s3044_s13, %s3045_s14  }
  0x2a   : > { %p3715_p13 = scmp.ne.s32.totalorder %s3713_s27, 0 }
  0x2b   : > { %p3716_p1 = scmp.eq.s32.totalorder (!%p3715_p13), %s3100_s19, 0 }
  0x2c   : > { %181 = sbr.rel (%p3715_p13) target bundleno = 1182 (0x49e), region = 36 }
  0x33   : > { %3020 = dma.done.wait (%p3716_p1), [#allocation3], 2048   ;;  %p3717_p0 = pmov %p3716_p1 }
  0x34   : > { %s2188_s23 = sshll.u32 %s3100_s19, 4  ;;  %v3046_v0 = vmov 1   ;;  %v230_v7 = vld [vmem:[%s3704_s1] sm:$0xff]  ;;  %v231_v8 = vld [vmem:[%s3704_s1 + $0x8] sm:$0xff]  ;;  %v3047_v20 = vmov 0   ;;  %v3048_v21 = vmov 2   ;;  %v232_v23 = vlaneseq }
  0x35   : > { %3022 = vsyncadd (%p3717_p0), [#allocation3], 4294965248  ;;  %2854 = vset.pattern.permute.xlu1 %v3046_v0  ;;  %2853 = vset.pattern.permute.xlu0 %v3046_v0  ;;  %p208_p5 = scmp.lt.s32.totalorder %s2188_s23, 31  ;;  %v3183_v9 = vpack.c.bf16 %v231_v8, %v230_v7  ;;  %v3205_v22 = vld [vmem:[%s3705_s2 + $0x40] sm:$0xff]   ;;  %vm330_vm0 = vcmask 130048   ;;  %v3049_v27 = vmov 0.0  }
  0x36   : > { %v3209_v24 = vand.u32 127, %v232_v23  ;;  %v2860_v62 = vld [vmem:[%s3705_s2 + $0x48] sm:$0xff]   ;;  %v2862_v8 = vld [vmem:[%s3705_s2 + $0x58] sm:$0xff]   ;;  %s204_s6 = sand.u32 1, %s3033_s16   ;;  %s2313_s10 = sshll.u32 %s3100_s19, 7 }
  0x37   : > { %s3725_s23 = smov (!%p208_p5, %s2188_s23), 31  ;;  %2707 = vmatprep.subr.bf16.mxu1 %v3183_v9  ;;  %2703 = vmatprep.subr.bf16.mxu0 %v3183_v9  ;;  %s2187_s7 = sshll.u32 %s204_s6, 3 }
  0x38   : > { %s2189_s28 = sshll.u32 %s3725_s23, 3  ;;  %2709 = vmatpush3.bf16.msra.mxu1 %v3183_v9  ;;  %2705 = vmatpush3.bf16.msra.mxu0 %v3183_v9  ;;  %s206_s8 = scalar_lea.vmem [#allocation5], %s2187_s7 }
  0x39   : > { %s3166_s29 = scalar_lea.vmem %s3703_s0, %s2189_s28  ;;  %2711 = vmatprep.subr.bf16.mxu1 %v3183_v9  ;;  %2508 = vmatprep.subr.bf16.mxu0 %v3205_v22  ;;  %s2110_s9 = sshll.u32 %s206_s8, 4  ;;  %s3658_s9 = int_to_ptr.vmem [resolvable:$true] %s2110_s9 }
  0x3a   : > { %v3169_v1 = vld [vmem:[%s3166_s29 + $0x10] sm:$0xff]  ;;  %v214_v2 = vld [vmem:[%s3166_s29] sm:$0xff]  ;;  %v217_v3 = vld [vmem:[%s3166_s29 + $0x18] sm:$0xff]  ;;  %s3663_s13 = scalar_lea.hbm %s3707_s4, %s2313_s10  ;;  %s2097_s14 = scalar_lea.sflag [#allocation4], %s204_s6 }
  0x3b   : > { %619 = vperm.xlu1 %2854, %v3169_v1   ;;  %613 = vperm.xlu0 %2853, %v214_v2   ;;  %v215_v4 = vld [vmem:[%s3166_s29 + $0x8] sm:$0xff]  ;;  %v218_v6 = vld [vmem:[%s3166_s29 + $0x20] sm:$0xff]  ;;  %v221_v10 = vld [vmem:[%s3166_s29 + $0x38] sm:$0xff]  ;;  %s2975_s20 = scalar_lea.vmem %s3658_s9, 128  ;;  %p3718_p9 = scmp.ne.s32.totalorder %s3711_s25, 0 }
  0x3c   : > { %v219_v5 = vld [vmem:[%s3166_s29 + $0x28] sm:$0xff]  ;;  %v220_v11 = vld [vmem:[%s3166_s29 + $0x30] sm:$0xff]  ;;  %v222_v13 = vld [vmem:[%s3166_s29 + $0x40] sm:$0xff]  ;;  %p2976_p6 = scmp.ne.s32.totalorder %s3658_s9, %s2975_s20  ;;  %s3053_s19 = smov [#allocation5]  }
  0x3d   : > { %v223_v12 = vld [vmem:[%s3166_s29 + $0x48] sm:$0xff]  ;;  %v225_v14 = vld [vmem:[%s3166_s29 + $0x58] sm:$0xff]  ;;  %v224_v15 = vld [vmem:[%s3166_s29 + $0x50] sm:$0xff]  ;;  %s2979_s22 = sshll.u32 %s3053_s19, 4  ;;  %s2980_s22 = int_to_ptr.vmem [resolvable:$false] %s2979_s22 }
  0x3e   : > { %v227_v16 = vld [vmem:[%s3166_s29 + $0x68] sm:$0xff]  ;;  %v226_v17 = vld [vmem:[%s3166_s29 + $0x60] sm:$0xff]  ;;  %v229_v18 = vld [vmem:[%s3166_s29 + $0x78] sm:$0xff]  ;;  %p2977_p10 = pnand %p2976_p6, %p3718_p9  ;;  %s2981_s23 = scalar_lea.vmem %s2980_s22, 256 }
  0x3f   : > { %622 = vperm.xlu1 %2854, %v217_v3   ;;  %616 = vperm.xlu0 %2853, %v215_v4   ;;  %v228_v19 = vld [vmem:[%s3166_s29 + $0x70] sm:$0xff]  ;;  %p2982_p2 = scmp.lt.s32.totalorder %s3658_s9, %s2980_s22  ;;  %p2983_p3 = scmp.lt.s32.totalorder %s2981_s23, %s2975_s20 }
  0x40   : > { %p2978_p12 = pneg %p2977_p10 }
  0x41   : > { %p2984_p4 = por %p2983_p3, %p2982_p2 }
  0x43   : > { %628 = vperm.xlu1 %2854, %v219_v5   ;;  %625 = vperm.xlu0 %2853, %v218_v6   ;;  %p2985_p7 = pnand %p2984_p4, %p2978_p12 }
  0x47   : > { %634 = vperm.xlu1 %2854, %v221_v10   ;;  %631 = vperm.xlu0 %2853, %v220_v11  }
  0x4b   : > { %640 = vperm.xlu1 %2854, %v223_v12   ;;  %637 = vperm.xlu0 %2853, %v222_v13  }
  0x4f   : > { %646 = vperm.xlu1 %2854, %v225_v14   ;;  %643 = vperm.xlu0 %2853, %v224_v15  }
  0x53   : > { %652 = vperm.xlu1 %2854, %v227_v16   ;;  %649 = vperm.xlu0 %2853, %v226_v17  }
  0x57   : > { %658 = vperm.xlu1 %2854, %v229_v18   ;;  %655 = vperm.xlu0 %2853, %v228_v19  }
  0x5b   : > { %2856 = vset.pattern.permute.xlu1 %v3047_v20  ;;  %2855 = vset.pattern.permute.xlu0 %v3047_v20 }
  0x5c   : > { %238 = vperm.xlu1 %2856, %v215_v4   ;;  %235 = vperm.xlu0 %2855, %v214_v2  }
  0x60   : > { %241 = vperm.xlu1 %2856, %v3169_v1   ;;  %244 = vperm.xlu0 %2855, %v217_v3  }
  0x64   : > { %247 = vperm.xlu1 %2856, %v218_v6   ;;  %250 = vperm.xlu0 %2855, %v219_v5  }
  0x68   : > { %253 = vperm.xlu1 %2856, %v220_v11   ;;  %256 = vperm.xlu0 %2855, %v221_v10  }
  0x6c   : > { %259 = vperm.xlu1 %2856, %v222_v13   ;;  %262 = vperm.xlu0 %2855, %v223_v12  }
  0x70   : > { %265 = vperm.xlu1 %2856, %v224_v15   ;;  %268 = vperm.xlu0 %2855, %v225_v14  }
  0x74   : > { %271 = vperm.xlu1 %2856, %v226_v17   ;;  %274 = vperm.xlu0 %2855, %v227_v16  }
  0x78   : > { %277 = vperm.xlu1 %2856, %v228_v19   ;;  %280 = vperm.xlu0 %2855, %v229_v18  }
  0x7c   : > { %2857 = vset.pattern.permute.xlu1 %v3048_v21  ;;  %2858 = vset.pattern.permute.xlu0 %v3048_v21 }
  0x7d   : > { %1280 = vperm.xlu1 %2857, %v214_v2   ;;  %1283 = vperm.xlu0 %2858, %v215_v4  }
  0x81   : > { %1286 = vperm.xlu1 %2857, %v3169_v1   ;;  %1292 = vperm.xlu0 %2858, %v218_v6  }
  0x85   : > { %1289 = vperm.xlu1 %2857, %v217_v3   ;;  %1298 = vperm.xlu0 %2858, %v220_v11   ;;  %v2861_v3 = vld [vmem:[%s3705_s2 + $0x50] sm:$0xff]  }
  0x89   : > { %1295 = vperm.xlu1 %2857, %v219_v5   ;;  %1304 = vperm.xlu0 %2858, %v222_v13   ;;  %v2863_v13 = vld [vmem:[%s3705_s2 + $0x60] sm:$0xff]  }
  0x8d   : > { %1301 = vperm.xlu1 %2857, %v221_v10   ;;  %1310 = vperm.xlu0 %2858, %v224_v15  }
  0x91   : > { %1307 = vperm.xlu1 %2857, %v223_v12   ;;  %1316 = vperm.xlu0 %2858, %v226_v17  }
  0x95   : > { %1313 = vperm.xlu1 %2857, %v225_v14   ;;  %1322 = vperm.xlu0 %2858, %v228_v19  }
  0x99   : > { %1319 = vperm.xlu1 %2857, %v227_v16  }
  0x9d   : > { %1325 = vperm.xlu1 %2857, %v229_v18   ;;  %v2864_v18 = vld [vmem:[%s3705_s2 + $0x68] sm:$0xff]  }
  0xba   : > { %v620_v25 = vpop.permute.xlu1 %619  ;;  %v614_v26 = vpop.permute.xlu0 %613 }
  0xbb   : > { %vm660_vm1 = vcmp.eq.s32.totalorder %v614_v26, %v3209_v24  ;;  %vm662_vm2 = vcmp.eq.s32.totalorder %v620_v25, %v3209_v24 }
  0xbc   : > { %v2222_v28 = vsel %vm660_vm1, 1.0, %v3049_v27  ;;  %v2224_v32 = vsel %vm662_vm2, 1.0, %v3049_v27 }
  0xbd   : > { %2484 = vmatprep.mubr.msk.f32.mxu1 %vm330_vm0, %v2222_v28 }
  0xbe   : > { %v623_v29 = vpop.permute.xlu1 %622  ;;  %v617_v30 = vpop.permute.xlu0 %616 }
  0xbf   : > { %vm661_vm3 = vcmp.eq.s32.totalorder %v617_v30, %v3209_v24  ;;  %vm663_vm4 = vcmp.eq.s32.totalorder %v623_v29, %v3209_v24 }
  0xc0   : > { %v2223_v31 = vsel %vm661_vm3, 1.0, %v3049_v27  ;;  %v2225_v35 = vsel %vm663_vm4, 1.0, %v3049_v27 }
  0xc1   : > { %2485 = vmatmul.mubr.msk.f32.vlgmr.msra.gmra.mrb[0].mxu1 %vm330_vm0, %v2223_v31 }
  0xc2   : > { %v629_v33 = vpop.permute.xlu1 %628  ;;  %2487 = vmatprep.mubr.msk.f32.mxu1 %vm330_vm0, %v2224_v32  ;;  %v626_v34 = vpop.permute.xlu0 %625  ;;  %2713 = vmatpush3.bf16.msra.mxu1 %v3183_v9 }
  0xc3   : > { %vm664_vm5 = vcmp.eq.s32.totalorder %v626_v34, %v3209_v24  ;;  %vm665_vm6 = vcmp.eq.s32.totalorder %v629_v33, %v3209_v24 }
  0xc4   : > { %v2226_v36 = vsel %vm664_vm5, 1.0, %v3049_v27  ;;  %v2227_v39 = vsel %vm665_vm6, 1.0, %v3049_v27 }
  0xc5   : > { %2488 = vmatmul.mubr.msk.f32.gmra.mrb[2].mxu1 %vm330_vm0, %v2225_v35 }
  0xc6   : > { %v635_v37 = vpop.permute.xlu1 %634  ;;  %2490 = vmatprep.mubr.msk.f32.mxu1 %vm330_vm0, %v2226_v36  ;;  %v632_v38 = vpop.permute.xlu0 %631 }
  0xc7   : > { %vm666_vm7 = vcmp.eq.s32.totalorder %v632_v38, %v3209_v24  ;;  %vm667_vm8 = vcmp.eq.s32.totalorder %v635_v37, %v3209_v24 }
  0xc8   : > { %v2228_v40 = vsel %vm666_vm7, 1.0, %v3049_v27  ;;  %v2229_v43 = vsel %vm667_vm8, 1.0, %v3049_v27 }
  0xc9   : > { %2491 = vmatmul.mubr.msk.f32.gmra.mrb[4].mxu1 %vm330_vm0, %v2227_v39 }
  0xca   : > { %v641_v41 = vpop.permute.xlu1 %640  ;;  %2493 = vmatprep.mubr.msk.f32.mxu1 %vm330_vm0, %v2228_v40  ;;  %v638_v42 = vpop.permute.xlu0 %637 }
  0xcb   : > { %vm668_vm9 = vcmp.eq.s32.totalorder %v638_v42, %v3209_v24  ;;  %vm669_vm10 = vcmp.eq.s32.totalorder %v641_v41, %v3209_v24 }
  0xcc   : > { %v2230_v44 = vsel %vm668_vm9, 1.0, %v3049_v27  ;;  %v2231_v47 = vsel %vm669_vm10, 1.0, %v3049_v27 }
  0xcd   : > { %2494 = vmatmul.mubr.msk.f32.gmra.mrb[6].mxu1 %vm330_vm0, %v2229_v43 }
  0xce   : > { %v647_v45 = vpop.permute.xlu1 %646  ;;  %2496 = vmatprep.mubr.msk.f32.mxu1 %vm330_vm0, %v2230_v44  ;;  %v644_v46 = vpop.permute.xlu0 %643 }
  0xcf   : > { %vm670_vm11 = vcmp.eq.s32.totalorder %v644_v46, %v3209_v24  ;;  %vm671_vm12 = vcmp.eq.s32.totalorder %v647_v45, %v3209_v24 }
  0xd0   : > { %v2232_v48 = vsel %vm670_vm11, 1.0, %v3049_v27  ;;  %v2233_v51 = vsel %vm671_vm12, 1.0, %v3049_v27 }
  0xd1   : > { %2497 = vmatmul.mubr.msk.f32.gmra.mrb[8].mxu1 %vm330_vm0, %v2231_v47 }
  0xd2   : > { %v653_v49 = vpop.permute.xlu1 %652  ;;  %2499 = vmatprep.mubr.msk.f32.mxu1 %vm330_vm0, %v2232_v48  ;;  %v650_v50 = vpop.permute.xlu0 %649 }
  0xd3   : > { %vm672_vm13 = vcmp.eq.s32.totalorder %v650_v50, %v3209_v24  ;;  %vm673_vm14 = vcmp.eq.s32.totalorder %v653_v49, %v3209_v24 }
  0xd4   : > { %v2234_v52 = vsel %vm672_vm13, 1.0, %v3049_v27  ;;  %v2235_v55 = vsel %vm673_vm14, 1.0, %v3049_v27 }
  0xd5   : > { %2500 = vmatmul.mubr.msk.f32.gmra.mrb[10].mxu1 %vm330_vm0, %v2233_v51 }
  0xd6   : > { %v659_v53 = vpop.permute.xlu1 %658  ;;  %2502 = vmatprep.mubr.msk.f32.mxu1 %vm330_vm0, %v2234_v52  ;;  %v656_v54 = vpop.permute.xlu0 %655 }
  0xd7   : > { %vm674_vm15 = vcmp.eq.s32.totalorder %v656_v54, %v3209_v24  ;;  %vm675_vm1 = vcmp.eq.s32.totalorder %v659_v53, %v3209_v24 }
  0xd8   : > { %v2236_v56 = vsel %vm674_vm15, 1.0, %v3049_v27  ;;  %v2237_v59 = vsel %vm675_vm1, 1.0, %v3049_v27 }
  0xd9   : > { %2503 = vmatmul.mubr.msk.f32.gmra.mrb[12].mxu1 %vm330_vm0, %v2235_v55 }
  0xda   : > { %2505 = vmatprep.mubr.msk.f32.mxu1 %vm330_vm0, %v2236_v56  ;;  %v2865_v56 = vld [vmem:[%s3705_s2 + $0x70] sm:$0xff]  }
  0xdb   : > { %v239_v57 = vpop.permute.xlu1 %238  ;;  %v236_v58 = vpop.permute.xlu0 %235 }
  0xdc   : > { %vm283_vm2 = vcmp.eq.s32.totalorder %v239_v57, %v3209_v24  ;;  %vm282_vm3 = vcmp.eq.s32.totalorder %v236_v58, %v3209_v24 }
  0xdd   : > { %v2191_v60 = vsel %vm283_vm2, 1.0, %v3049_v27  ;;  %2506 = vmatmul.mubr.msk.f32.gmra.mrb[14].mxu1 %vm330_vm0, %v2237_v59  ;;  %v2190_v61 = vsel %vm282_vm3, 1.0, %v3049_v27 }
  0xde   : > { %2456 = vmatprep.mubr.msk.f32.mxu0 %vm330_vm0, %v2190_v61  ;;  %v2866_v61 = vld [vmem:[%s3705_s2 + $0x78] sm:$0xff]  }
  0xdf   : > { %v242_v63 = vpop.permute.xlu1 %241  ;;  %2457 = vmatmul.mubr.msk.f32.vlgmr.msra.gmra.mrb[0].mxu0 %vm330_vm0, %v2191_v60  ;;  %v245_v0 = vpop.permute.xlu0 %244 }
  0xe0   : > { %vm284_vm4 = vcmp.eq.s32.totalorder %v242_v63, %v3209_v24  ;;  %vm285_vm5 = vcmp.eq.s32.totalorder %v245_v0, %v3209_v24  ;;  %2509 = vmatpush3.bf16.msra.mxu0 %v3205_v22 }
  0xe1   : > { %v2192_v1 = vsel %vm284_vm4, 1.0, %v3049_v27  ;;  %v2193_v2 = vsel %vm285_vm5, 1.0, %v3049_v27  ;;  %2510 = vmatprep.subr.bf16.mxu0 %v2860_v62 }
  0xe2   : > { %2459 = vmatprep.mubr.msk.f32.mxu0 %vm330_vm0, %v2192_v1  ;;  %v2867_v1 = vld [vmem:[%s3705_s2] sm:$0xff]  }
  0xe3   : > { %v248_v4 = vpop.permute.xlu1 %247  ;;  %2460 = vmatmul.mubr.msk.f32.gmra.mrb[2].mxu0 %vm330_vm0, %v2193_v2  ;;  %v251_v5 = vpop.permute.xlu0 %250 }
  0xe4   : > { %vm286_vm6 = vcmp.eq.s32.totalorder %v248_v4, %v3209_v24  ;;  %vm287_vm7 = vcmp.eq.s32.totalorder %v251_v5, %v3209_v24  ;;  %2511 = vmatpush3.bf16.msra.mxu0 %v2860_v62 }
  0xe5   : > { %v2194_v6 = vsel %vm286_vm6, 1.0, %v3049_v27  ;;  %v2195_v7 = vsel %vm287_vm7, 1.0, %v3049_v27  ;;  %2512 = vmatprep.subr.bf16.mxu0 %v2861_v3 }
  0xe6   : > { %2462 = vmatprep.mubr.msk.f32.mxu0 %vm330_vm0, %v2194_v6 }
  0xe7   : > { %v254_v9 = vpop.permute.xlu1 %253  ;;  %2463 = vmatmul.mubr.msk.f32.gmra.mrb[4].mxu0 %vm330_vm0, %v2195_v7  ;;  %v257_v10 = vpop.permute.xlu0 %256 }
  0xe8   : > { %vm288_vm8 = vcmp.eq.s32.totalorder %v254_v9, %v3209_v24  ;;  %vm289_vm9 = vcmp.eq.s32.totalorder %v257_v10, %v3209_v24  ;;  %2513 = vmatpush3.bf16.msra.mxu0 %v2861_v3 }
  0xe9   : > { %v2196_v11 = vsel %vm288_vm8, 1.0, %v3049_v27  ;;  %v2197_v12 = vsel %vm289_vm9, 1.0, %v3049_v27  ;;  %2514 = vmatprep.subr.bf16.mxu0 %v2862_v8 }
  0xea   : > { %2465 = vmatprep.mubr.msk.f32.mxu0 %vm330_vm0, %v2196_v11 }
  0xeb   : > { %v260_v14 = vpop.permute.xlu1 %259  ;;  %2466 = vmatmul.mubr.msk.f32.gmra.mrb[6].mxu0 %vm330_vm0, %v2197_v12  ;;  %v263_v15 = vpop.permute.xlu0 %262  ;;  %v2868_v12 = vld [vmem:[%s3705_s2 + $0x8] sm:$0xff]  }
  0xec   : > { %vm290_vm10 = vcmp.eq.s32.totalorder %v260_v14, %v3209_v24  ;;  %vm291_vm11 = vcmp.eq.s32.totalorder %v263_v15, %v3209_v24  ;;  %2515 = vmatpush3.bf16.msra.mxu0 %v2862_v8 }
  0xed   : > { %v2198_v16 = vsel %vm290_vm10, 1.0, %v3049_v27  ;;  %v2199_v17 = vsel %vm291_vm11, 1.0, %v3049_v27  ;;  %2516 = vmatprep.subr.bf16.mxu0 %v2863_v13 }
  0xee   : > { %2468 = vmatprep.mubr.msk.f32.mxu0 %vm330_vm0, %v2198_v16  ;;  %v2869_v16 = vld [vmem:[%s3705_s2 + $0x10] sm:$0xff]  }
  0xef   : > { %v266_v19 = vpop.permute.xlu1 %265  ;;  %2469 = vmatmul.mubr.msk.f32.gmra.mrb[8].mxu0 %vm330_vm0, %v2199_v17  ;;  %v269_v20 = vpop.permute.xlu0 %268 }
  0xf0   : > { %vm292_vm12 = vcmp.eq.s32.totalorder %v266_v19, %v3209_v24  ;;  %vm293_vm13 = vcmp.eq.s32.totalorder %v269_v20, %v3209_v24  ;;  %2517 = vmatpush3.bf16.msra.mxu0 %v2863_v13  ;;  %v2870_v20 = vld [vmem:[%s3705_s2 + $0x18] sm:$0xff]  }
  0xf1   : > { %v2200_v21 = vsel %vm292_vm12, 1.0, %v3049_v27  ;;  %v2201_v22 = vsel %vm293_vm13, 1.0, %v3049_v27  ;;  %2518 = vmatprep.subr.bf16.mxu0 %v2864_v18 }
  0xf2   : > { %2471 = vmatprep.mubr.msk.f32.mxu0 %vm330_vm0, %v2200_v21 }
  0xf3   : > { %v272_v25 = vpop.permute.xlu1 %271  ;;  %2472 = vmatmul.mubr.msk.f32.gmra.mrb[10].mxu0 %vm330_vm0, %v2201_v22  ;;  %v275_v26 = vpop.permute.xlu0 %274 }
  0xf4   : > { %vm294_vm14 = vcmp.eq.s32.totalorder %v272_v25, %v3209_v24  ;;  %vm295_vm15 = vcmp.eq.s32.totalorder %v275_v26, %v3209_v24  ;;  %2519 = vmatpush3.bf16.msra.mxu0 %v2864_v18  ;;  %v2871_v26 = vld [vmem:[%s3705_s2 + $0x20] sm:$0xff]  }
  0xf5   : > { %v2202_v28 = vsel %vm294_vm14, 1.0, %v3049_v27  ;;  %v2203_v29 = vsel %vm295_vm15, 1.0, %v3049_v27  ;;  %2520 = vmatprep.subr.bf16.mxu0 %v2865_v56 }
  0xf6   : > { %2474 = vmatprep.mubr.msk.f32.mxu0 %vm330_vm0, %v2202_v28 }
  0xf7   : > { %v278_v30 = vpop.permute.xlu1 %277  ;;  %2475 = vmatmul.mubr.msk.f32.gmra.mrb[12].mxu0 %vm330_vm0, %v2203_v29  ;;  %v281_v31 = vpop.permute.xlu0 %280 }
  0xf8   : > { %vm296_vm1 = vcmp.eq.s32.totalorder %v278_v30, %v3209_v24  ;;  %vm297_vm2 = vcmp.eq.s32.totalorder %v281_v31, %v3209_v24  ;;  %2521 = vmatpush3.bf16.msra.mxu0 %v2865_v56  ;;  %v2872_v31 = vld [vmem:[%s3705_s2 + $0x28] sm:$0xff]  }
  0xf9   : > { %v2204_v32 = vsel %vm296_vm1, 1.0, %v3049_v27  ;;  %v2205_v33 = vsel %vm297_vm2, 1.0, %v3049_v27  ;;  %2522 = vmatprep.subr.bf16.mxu0 %v2866_v61 }
  0xfa   : > { %2477 = vmatprep.mubr.msk.f32.mxu0 %vm330_vm0, %v2204_v32 }
  0xfb   : > { %2478 = vmatmul.mubr.msk.f32.gmra.mrb[14].mxu0 %vm330_vm0, %v2205_v33 }
  0xfc   : > { %v1281_v34 = vpop.permute.xlu1 %1280  ;;  %v1284_v35 = vpop.permute.xlu0 %1283  ;;  %2523 = vmatpush3.bf16.msra.mxu0 %v2866_v61 }
  0xfd   : > { %vm1327_vm3 = vcmp.eq.s32.totalorder %v1281_v34, %v3209_v24  ;;  %vm1328_vm4 = vcmp.eq.s32.totalorder %v1284_v35, %v3209_v24  ;;  %2540 = vmatprep.subr.bf16.mxu0 %v2867_v1  ;;  %v2873_v35 = vld [vmem:[%s3705_s2 + $0x30] sm:$0xff]  }
  0xfe   : > { %v2270_v36 = vsel %vm1327_vm3, 1.0, %v3049_v27  ;;  %v2271_v37 = vsel %vm1328_vm4, 1.0, %v3049_v27 }
  0xff   : > { %2576 = vmatprep.mubr.msk.f32.mxu1 %vm330_vm0, %v2270_v36 }
 0x100   : > { %v1287_v38 = vpop.permute.xlu1 %1286  ;;  %v1293_v39 = vpop.permute.xlu0 %1292  ;;  %2577 = vmatmul.mubr.msk.f32.vlgmr.msra.gmra.mrb[16].mxu1 %vm330_vm0, %v2271_v37 }
 0x101   : > { %vm1329_vm5 = vcmp.eq.s32.totalorder %v1287_v38, %v3209_v24  ;;  %vm1331_vm6 = vcmp.eq.s32.totalorder %v1293_v39, %v3209_v24 }
 0x102   : > { %v2272_v40 = vsel %vm1329_vm5, 1.0, %v3049_v27  ;;  %v2274_v44 = vsel %vm1331_vm6, 1.0, %v3049_v27 }
 0x103   : > { %2579 = vmatprep.mubr.msk.f32.mxu1 %vm330_vm0, %v2272_v40 }
 0x104   : > { %v1290_v41 = vpop.permute.xlu1 %1289  ;;  %v1299_v42 = vpop.permute.xlu0 %1298 }
 0x105   : > { %vm1330_vm7 = vcmp.eq.s32.totalorder %v1290_v41, %v3209_v24  ;;  %vm1333_vm8 = vcmp.eq.s32.totalorder %v1299_v42, %v3209_v24  ;;  %v2874_v42 = vld [vmem:[%s3705_s2 + $0x38] sm:$0xff]  }
 0x106   : > { %v2273_v43 = vsel %vm1330_vm7, 1.0, %v3049_v27  ;;  %v2276_v48 = vsel %vm1333_vm8, 1.0, %v3049_v27 }
 0x107   : > { %2580 = vmatmul.mubr.msk.f32.gmra.mrb[18].mxu1 %vm330_vm0, %v2273_v43 }
 0x108   : > { %v1296_v45 = vpop.permute.xlu1 %1295  ;;  %2582 = vmatprep.mubr.msk.f32.mxu1 %vm330_vm0, %v2274_v44  ;;  %v1305_v46 = vpop.permute.xlu0 %1304 }
 0x109   : > { %vm1332_vm9 = vcmp.eq.s32.totalorder %v1296_v45, %v3209_v24  ;;  %vm1335_vm10 = vcmp.eq.s32.totalorder %v1305_v46, %v3209_v24 }
 0x10a   : > { %v2275_v47 = vsel %vm1332_vm9, 1.0, %v3049_v27  ;;  %v2278_v52 = vsel %vm1335_vm10, 1.0, %v3049_v27 }
 0x10b   : > { %2583 = vmatmul.mubr.msk.f32.gmra.mrb[20].mxu1 %vm330_vm0, %v2275_v47  ;;  %v2875_v47 = vld [vmem:[%s3705_s2 + $0x80] sm:$0xff]  }
 0x10c   : > { %v1302_v49 = vpop.permute.xlu1 %1301  ;;  %2585 = vmatprep.mubr.msk.f32.mxu1 %vm330_vm0, %v2276_v48  ;;  %v1311_v50 = vpop.permute.xlu0 %1310 }
 0x10d   : > { %vm1334_vm11 = vcmp.eq.s32.totalorder %v1302_v49, %v3209_v24  ;;  %vm1337_vm12 = vcmp.eq.s32.totalorder %v1311_v50, %v3209_v24 }
 0x10e   : > { %v2277_v51 = vsel %vm1334_vm11, 1.0, %v3049_v27  ;;  %v2280_v57 = vsel %vm1337_vm12, 1.0, %v3049_v27 }
 0x10f   : > { %2586 = vmatmul.mubr.msk.f32.gmra.mrb[22].mxu1 %vm330_vm0, %v2277_v51 }
 0x110   : > { %v1308_v53 = vpop.permute.xlu1 %1307  ;;  %2588 = vmatprep.mubr.msk.f32.mxu1 %vm330_vm0, %v2278_v52  ;;  %v1317_v54 = vpop.permute.xlu0 %1316 }
 0x111   : > { %vm1336_vm13 = vcmp.eq.s32.totalorder %v1308_v53, %v3209_v24  ;;  %vm1339_vm14 = vcmp.eq.s32.totalorder %v1317_v54, %v3209_v24  ;;  %v2876_v53 = vld [vmem:[%s3705_s2 + $0x88] sm:$0xff]  }
 0x112   : > { %v2279_v55 = vsel %vm1336_vm13, 1.0, %v3049_v27  ;;  %v2282_v62 = vsel %vm1339_vm14, 1.0, %v3049_v27 }
 0x113   : > { %2589 = vmatmul.mubr.msk.f32.gmra.mrb[24].mxu1 %vm330_vm0, %v2279_v55 }
 0x114   : > { %v1314_v58 = vpop.permute.xlu1 %1313  ;;  %2591 = vmatprep.mubr.msk.f32.mxu1 %vm330_vm0, %v2280_v57  ;;  %v1323_v59 = vpop.permute.xlu0 %1322 }
 0x115   : > { %vm1338_vm15 = vcmp.eq.s32.totalorder %v1314_v58, %v3209_v24  ;;  %vm1341_vm1 = vcmp.eq.s32.totalorder %v1323_v59, %v3209_v24  ;;  %v2877_v59 = vld [vmem:[%s3705_s2 + $0x90] sm:$0xff]  }
 0x116   : > { %v2281_v60 = vsel %vm1338_vm15, 1.0, %v3049_v27  ;;  %v2284_v2 = vsel %vm1341_vm1, 1.0, %v3049_v27 }
 0x117   : > { %2592 = vmatmul.mubr.msk.f32.gmra.mrb[26].mxu1 %vm330_vm0, %v2281_v60 }
 0x118   : > { %v1320_v63 = vpop.permute.xlu1 %1319  ;;  %2594 = vmatprep.mubr.msk.f32.mxu1 %vm330_vm0, %v2282_v62 }
 0x119   : > { %vm1340_vm2 = vcmp.eq.s32.totalorder %v1320_v63, %v3209_v24 }
 0x11a   : > { %v2283_v0 = vsel %vm1340_vm2, 1.0, %v3049_v27 }
 0x11b   : > { %2595 = vmatmul.mubr.msk.f32.gmra.mrb[28].mxu1 %vm330_vm0, %v2283_v0 }
 0x11c   : > { %v1326_v3 = vpop.permute.xlu1 %1325  ;;  %2597 = vmatprep.mubr.msk.f32.mxu1 %vm330_vm0, %v2284_v2 }
 0x11d   : > { %vm1342_vm3 = vcmp.eq.s32.totalorder %v1326_v3, %v3209_v24 }
 0x11e   : > { %v2285_v4 = vsel %vm1342_vm3, 1.0, %v3049_v27 }
 0x11f   : > { %2598 = vmatmul.mubr.msk.f32.gmra.mrb[30].mxu1 %vm330_vm0, %v2285_v4  ;;  %vm3051_vm0 = vmmov 0  }
 0x120   : > { %2664 = vmatprep.mubr.msk.f32.mxu1 %vm3051_vm0, %v3049_v27 }
 0x194   : > { %v2486_v5 = vpop.f32.mrb[0].mxu1 }
 0x195   : > { %v3381_v6 = vpop.f32.mrb[1].mxu1  ;;  %v902_v7 = vmul.f32 %v2486_v5, %v2486_v5 }
 0x196   : > { %v965_v8 = vpack.c.bf16 %v2486_v5, %v3381_v6  ;;  %v901_v49 = vmul.f32 %v3381_v6, %v3381_v6 }
 0x197   : > { %919 = vadd.xlane.f32.xlu0 %v902_v7  ;;  %v2879_v7 = vld [vmem:[%s3705_s2 + $0xa0] sm:$0xff]  }
 0x198   : > { %v3384_v9 = vpop.f32.mrb[2].mxu1  ;;  %2524 = vmatprep.mubr.bf16.mxu0 %v965_v8 }
 0x199   : > { %v3386_v10 = vpop.f32.mrb[3].mxu1  ;;  %v904_v61 = vmul.f32 %v3384_v9, %v3384_v9 }
 0x19a   : > { %v966_v11 = vpack.c.bf16 %v3384_v9, %v3386_v10  ;;  %v903_v56 = vmul.f32 %v3386_v10, %v3386_v10 }
 0x19c   : > { %v3393_v13 = vpop.f32.mrb[4].mxu1  ;;  %2525 = vmatmul.mubr.bf16.vlgmr.msra.gmra.mrb[16].mxu0 %v966_v11 }
 0x19d   : > { %v3395_v14 = vpop.f32.mrb[5].mxu1  ;;  %2541 = vmatpush3.bf16.msra.mxu0 %v2867_v1  ;;  %v2878_v1 = vld [vmem:[%s3705_s2 + $0x98] sm:$0xff]   ;;  %v906_v9 = vmul.f32 %v3393_v13, %v3393_v13 }
 0x19e   : > { %v967_v15 = vpack.c.bf16 %v3393_v13, %v3395_v14  ;;  %2542 = vmatprep.subr.bf16.mxu0 %v2868_v12  ;;  %v905_v4 = vmul.f32 %v3395_v14, %v3395_v14  ;;  %v2880_v14 = vld [vmem:[%s3705_s2 + $0xa8] sm:$0xff]  }
 0x1a0   : > { %v3402_v17 = vpop.f32.mrb[6].mxu1  ;;  %2528 = vmatprep.mubr.bf16.mxu0 %v967_v15 }
 0x1a1   : > { %v3404_v18 = vpop.f32.mrb[7].mxu1  ;;  %2543 = vmatpush3.bf16.msra.mxu0 %v2868_v12 }
 0x1a2   : > { %v968_v19 = vpack.c.bf16 %v3402_v17, %v3404_v18  ;;  %2544 = vmatprep.subr.bf16.mxu0 %v2869_v16 }
 0x1a4   : > { %v3411_v21 = vpop.f32.mrb[8].mxu1  ;;  %2529 = vmatmul.mubr.bf16.gmra.mrb[20].mxu0 %v968_v19  ;;  %v907_v19 = vmul.f32 %v3404_v18, %v3404_v18 }
 0x1a5   : > { %v3413_v22 = vpop.f32.mrb[9].mxu1  ;;  %2545 = vmatpush3.bf16.msra.mxu0 %v2869_v16 }
 0x1a6   : > { %v969_v25 = vpack.c.bf16 %v3411_v21, %v3413_v22  ;;  %2546 = vmatprep.subr.bf16.mxu0 %v2870_v20 }
 0x1a8   : > { %v3420_v28 = vpop.f32.mrb[10].mxu1  ;;  %2532 = vmatprep.mubr.bf16.mxu0 %v969_v25  ;;  %v2881_v25 = vld [vmem:[%s3705_s2 + $0xb0] sm:$0xff]  }
 0x1a9   : > { %v3422_v29 = vpop.f32.mrb[11].mxu1  ;;  %2547 = vmatpush3.bf16.msra.mxu0 %v2870_v20 }
 0x1aa   : > { %v970_v30 = vpack.c.bf16 %v3420_v28, %v3422_v29  ;;  %2548 = vmatprep.subr.bf16.mxu0 %v2871_v26 }
 0x1ac   : > { %v3429_v32 = vpop.f32.mrb[12].mxu1  ;;  %2533 = vmatmul.mubr.bf16.gmra.mrb[24].mxu0 %v970_v30  ;;  %v908_v30 = vmul.f32 %v3402_v17, %v3402_v17  ;;  %v910_v17 = vmul.f32 %v3411_v21, %v3411_v21  ;;  %v912_v21 = vmul.f32 %v3420_v28, %v3420_v28 }
 0x1ad   : > { %v3431_v33 = vpop.f32.mrb[13].mxu1  ;;  %2549 = vmatpush3.bf16.msra.mxu0 %v2871_v26  ;;  %v914_v28 = vmul.f32 %v3429_v32, %v3429_v32 }
 0x1ae   : > { %v971_v34 = vpack.c.bf16 %v3429_v32, %v3431_v33  ;;  %2550 = vmatprep.subr.bf16.mxu0 %v2872_v31 }
 0x1b0   : > { %v3438_v36 = vpop.f32.mrb[14].mxu1  ;;  %2536 = vmatprep.mubr.bf16.mxu0 %v971_v34  ;;  %v2882_v34 = vld [vmem:[%s3705_s2 + $0xb8] sm:$0xff]  }
 0x1b1   : > { %v3440_v37 = vpop.f32.mrb[15].mxu1  ;;  %2551 = vmatpush3.bf16.msra.mxu0 %v2872_v31  ;;  %v916_v32 = vmul.f32 %v3438_v36, %v3438_v36 }
 0x1b2   : > { %v972_v38 = vpack.c.bf16 %v3438_v36, %v3440_v37  ;;  %v2458_v39 = vpop.f32.mrb[0].mxu0  ;;  %2552 = vmatprep.subr.bf16.mxu0 %v2873_v35 }
 0x1b3   : > { %v445_v40 = vpop.f32.mrb[1].mxu0  ;;  %v525_v41 = vmul.f32 %v2458_v39, %v2458_v39 }
 0x1b4   : > { %v588_v43 = vpack.c.bf16 %v2458_v39, %v445_v40  ;;  %2537 = vmatmul.mubr.bf16.gmra.mrb[28].mxu0 %v972_v38  ;;  %v524_v44 = vmul.f32 %v445_v40, %v445_v40  ;;  %v909_v38 = vmul.f32 %v3413_v22, %v3413_v22  ;;  %v911_v22 = vmul.f32 %v3422_v29, %v3422_v29 }
 0x1b5   : > { %542 = vadd.xlane.f32.xlu1 %v525_v41  ;;  %2553 = vmatpush3.bf16.msra.mxu0 %v2873_v35  ;;  %v913_v29 = vmul.f32 %v3431_v33, %v3431_v33  ;;  %v915_v33 = vmul.f32 %v3440_v37, %v3440_v37 }
 0x1b6   : > { %540 = vadd.xlane.f32.xlu0 %v524_v44  ;;  %v2461_v45 = vpop.f32.mrb[2].mxu0  ;;  %2556 = vmatprep.mubr.bf16.mxu0 %v588_v43 }
 0x1b7   : > { %v455_v46 = vpop.f32.mrb[3].mxu0  ;;  %2554 = vmatprep.subr.bf16.mxu0 %v2874_v42  ;;  %v527_v55 = vmul.f32 %v2461_v45, %v2461_v45 }
 0x1b8   : > { %v589_v48 = vpack.c.bf16 %v2461_v45, %v455_v46  ;;  %v526_v50 = vmul.f32 %v455_v46, %v455_v46 }
 0x1b9   : > { %2555 = vmatpush3.bf16.msra.mxu0 %v2874_v42 }
 0x1ba   : > { %917 = vadd.xlane.f32.xlu0 %v901_v49  ;;  %544 = vadd.xlane.f32.xlu1 %v526_v50  ;;  %v2464_v51 = vpop.f32.mrb[4].mxu0 }
 0x1bb   : > { %v465_v52 = vpop.f32.mrb[5].mxu0  ;;  %2600 = vmatprep.subr.bf16.mxu0 %v2875_v47  ;;  %v529_v3 = vmul.f32 %v2464_v51, %v2464_v51 }
 0x1bc   : > { %v590_v54 = vpack.c.bf16 %v2464_v51, %v465_v52  ;;  %2557 = vmatmul.mubr.bf16.vlgmr.msra.gmra.mrb[16].mxu0 %v589_v48  ;;  %v528_v62 = vmul.f32 %v465_v52, %v465_v52 }
 0x1bd   : > { %2601 = vmatpush3.bf16.msra.mxu0 %v2875_v47 }
 0x1be   : > { %546 = vadd.xlane.f32.xlu0 %v527_v55  ;;  %921 = vadd.xlane.f32.xlu1 %v903_v56  ;;  %v2467_v57 = vpop.f32.mrb[6].mxu0 }
 0x1bf   : > { %2560 = vmatprep.mubr.bf16.mxu0 %v590_v54  ;;  %v475_v58 = vpop.f32.mrb[7].mxu0  ;;  %2602 = vmatprep.subr.bf16.mxu0 %v2876_v53  ;;  %v531_v16 = vmul.f32 %v2467_v57, %v2467_v57 }
 0x1c0   : > { %v591_v60 = vpack.c.bf16 %v2467_v57, %v475_v58  ;;  %v530_v10 = vmul.f32 %v475_v58, %v475_v58 }
 0x1c1   : > { %2603 = vmatpush3.bf16.msra.mxu0 %v2876_v53 }
 0x1c2   : > { %923 = vadd.xlane.f32.xlu0 %v904_v61  ;;  %548 = vadd.xlane.f32.xlu1 %v528_v62  ;;  %v2470_v63 = vpop.f32.mrb[8].mxu0 }
 0x1c3   : > { %v485_v0 = vpop.f32.mrb[9].mxu0  ;;  %2604 = vmatprep.subr.bf16.mxu0 %v2877_v59  ;;  %v533_v35 = vmul.f32 %v2470_v63, %v2470_v63 }
 0x1c4   : > { %v592_v2 = vpack.c.bf16 %v2470_v63, %v485_v0  ;;  %2561 = vmatmul.mubr.bf16.gmra.mrb[20].mxu0 %v591_v60  ;;  %v532_v31 = vmul.f32 %v485_v0, %v485_v0 }
 0x1c5   : > { %2605 = vmatpush3.bf16.msra.mxu0 %v2877_v59 }
 0x1c6   : > { %550 = vadd.xlane.f32.xlu0 %v529_v3  ;;  %925 = vadd.xlane.f32.xlu1 %v905_v4  ;;  %v2473_v5 = vpop.f32.mrb[10].mxu0 }
 0x1c7   : > { %2564 = vmatprep.mubr.bf16.mxu0 %v592_v2  ;;  %v495_v6 = vpop.f32.mrb[11].mxu0  ;;  %2606 = vmatprep.subr.bf16.mxu0 %v2878_v1  ;;  %v535_v45 = vmul.f32 %v2473_v5, %v2473_v5 }
 0x1c8   : > { %v593_v8 = vpack.c.bf16 %v2473_v5, %v495_v6  ;;  %v534_v41 = vmul.f32 %v495_v6, %v495_v6 }
 0x1c9   : > { %2607 = vmatpush3.bf16.msra.mxu0 %v2878_v1 }
 0x1ca   : > { %927 = vadd.xlane.f32.xlu0 %v906_v9  ;;  %552 = vadd.xlane.f32.xlu1 %v530_v10  ;;  %v2476_v11 = vpop.f32.mrb[12].mxu0 }
 0x1cb   : > { %v505_v12 = vpop.f32.mrb[13].mxu0  ;;  %2608 = vmatprep.subr.bf16.mxu0 %v2879_v7  ;;  %v537_v53 = vmul.f32 %v2476_v11, %v2476_v11 }
 0x1cc   : > { %v594_v15 = vpack.c.bf16 %v2476_v11, %v505_v12  ;;  %2565 = vmatmul.mubr.bf16.gmra.mrb[24].mxu0 %v593_v8  ;;  %v536_v49 = vmul.f32 %v505_v12, %v505_v12 }
 0x1cd   : > { %2609 = vmatpush3.bf16.msra.mxu0 %v2879_v7 }
 0x1ce   : > { %554 = vadd.xlane.f32.xlu0 %v531_v16  ;;  %929 = vadd.xlane.f32.xlu1 %v907_v19  ;;  %v3477_v13 = vpop.f32.mrb[14].mxu0 }
 0x1cf   : > { %2568 = vmatprep.mubr.bf16.mxu0 %v594_v15  ;;  %v515_v20 = vpop.f32.mrb[15].mxu0  ;;  %2610 = vmatprep.subr.bf16.mxu0 %v2880_v14  ;;  %v539_v61 = vmul.f32 %v3477_v13, %v3477_v13 }
 0x1d0   : > { %v595_v26 = vpack.c.bf16 %v3477_v13, %v515_v20  ;;  %v538_v57 = vmul.f32 %v515_v20, %v515_v20 }
 0x1d1   : > { %2611 = vmatpush3.bf16.msra.mxu0 %v2880_v14 }
 0x1d2   : > { %931 = vadd.xlane.f32.xlu0 %v908_v30  ;;  %556 = vadd.xlane.f32.xlu1 %v532_v31 }
 0x1d3   : > { %v3485_v18 = vpop.f32.mrb[16].mxu1  ;;  %2612 = vmatprep.subr.bf16.mxu0 %v2881_v25 }
 0x1d4   : > { %2569 = vmatmul.mubr.bf16.gmra.mrb[28].mxu0 %v595_v26  ;;  %v1489_v39 = vpop.f32.mrb[17].mxu1  ;;  %v1569_v5 = vmul.f32 %v3485_v18, %v3485_v18 }
 0x1d5   : > { %v1632_v40 = vpack.c.bf16 %v3485_v18, %v1489_v39  ;;  %2613 = vmatpush3.bf16.msra.mxu0 %v2881_v25  ;;  %v1568_v1 = vmul.f32 %v1489_v39, %v1489_v39  ;;  %v3050_v18 = vmov 0.0|0.0  }
 0x1d6   : > { %558 = vadd.xlane.f32.xlu0 %v533_v35  ;;  %933 = vadd.xlane.f32.xlu1 %v909_v38 }
 0x1d7   : > { %2616 = vmatprep.mubr.bf16.mxu0 %v1632_v40  ;;  %2614 = vmatprep.subr.bf16.mxu0 %v2882_v34 }
 0x1d8   : > { %2714 = vmatprep.subr.bf16.mxu1 %v3050_v18 }
 0x1d9   : > { %2615 = vmatpush3.bf16.msra.mxu0 %v2882_v34 }
 0x1da   : > { %935 = vadd.xlane.f32.xlu0 %v910_v17  ;;  %560 = vadd.xlane.f32.xlu1 %v534_v41  ;;  %v2581_v42 = vpop.f32.mrb[18].mxu1 }
 0x1db   : > { %v1499_v43 = vpop.f32.mrb[19].mxu1  ;;  %v1571_v6 = vmul.f32 %v2581_v42, %v2581_v42 }
 0x1dc   : > { %v1633_v44 = vpack.c.bf16 %v2581_v42, %v1499_v43  ;;  %v1570_v37 = vmul.f32 %v1499_v43, %v1499_v43 }
 0x1de   : > { %562 = vadd.xlane.f32.xlu0 %v535_v45  ;;  %937 = vadd.xlane.f32.xlu1 %v911_v22  ;;  %v2584_v46 = vpop.f32.mrb[20].mxu1 }
 0x1df   : > { %2617 = vmatmul.mubr.bf16.vlgmr.msra.gmra.mrb[16].mxu0 %v1633_v44  ;;  %v1509_v47 = vpop.f32.mrb[21].mxu1  ;;  %v1573_v8 = vmul.f32 %v2584_v46, %v2584_v46 }
 0x1e0   : > { %v1634_v48 = vpack.c.bf16 %v2584_v46, %v1509_v47  ;;  %v1572_v7 = vmul.f32 %v1509_v47, %v1509_v47 }
 0x1e2   : > { %939 = vadd.xlane.f32.xlu0 %v912_v21  ;;  %564 = vadd.xlane.f32.xlu1 %v536_v49  ;;  %v2587_v50 = vpop.f32.mrb[22].mxu1 }
 0x1e3   : > { %2620 = vmatprep.mubr.bf16.mxu0 %v1634_v48  ;;  %v1519_v51 = vpop.f32.mrb[23].mxu1  ;;  %v1575_v9 = vmul.f32 %v2587_v50, %v2587_v50 }
 0x1e4   : > { %v1635_v52 = vpack.c.bf16 %v2587_v50, %v1519_v51  ;;  %v1574_v36 = vmul.f32 %v1519_v51, %v1519_v51 }
 0x1e6   : > { %566 = vadd.xlane.f32.xlu0 %v537_v53  ;;  %941 = vadd.xlane.f32.xlu1 %v913_v29  ;;  %v2590_v54 = vpop.f32.mrb[24].mxu1 }
 0x1e7   : > { %2621 = vmatmul.mubr.bf16.gmra.mrb[20].mxu0 %v1635_v52  ;;  %v1529_v55 = vpop.f32.mrb[25].mxu1  ;;  %v1577_v11 = vmul.f32 %v2590_v54, %v2590_v54 }
 0x1e8   : > { %v1636_v56 = vpack.c.bf16 %v2590_v54, %v1529_v55  ;;  %v1576_v10 = vmul.f32 %v1529_v55, %v1529_v55 }
 0x1ea   : > { %943 = vadd.xlane.f32.xlu0 %v914_v28  ;;  %568 = vadd.xlane.f32.xlu1 %v538_v57  ;;  %v2593_v58 = vpop.f32.mrb[26].mxu1 }
 0x1eb   : > { %2624 = vmatprep.mubr.bf16.mxu0 %v1636_v56  ;;  %v1539_v59 = vpop.f32.mrb[27].mxu1  ;;  %v1579_v14 = vmul.f32 %v2593_v58, %v2593_v58 }
 0x1ec   : > { %v1637_v60 = vpack.c.bf16 %v2593_v58, %v1539_v59  ;;  %v1578_v12 = vmul.f32 %v1539_v59, %v1539_v59 }
 0x1ee   : > { %570 = vadd.xlane.f32.xlu0 %v539_v61  ;;  %945 = vadd.xlane.f32.xlu1 %v915_v33  ;;  %v2596_v62 = vpop.f32.mrb[28].mxu1 }
 0x1ef   : > { %2625 = vmatmul.mubr.bf16.gmra.mrb[24].mxu0 %v1637_v60  ;;  %v1549_v63 = vpop.f32.mrb[29].mxu1  ;;  %v1581_v16 = vmul.f32 %v2596_v62, %v2596_v62 }
 0x1f0   : > { %v1638_v0 = vpack.c.bf16 %v2596_v62, %v1549_v63  ;;  %v1580_v15 = vmul.f32 %v1549_v63, %v1549_v63 }
 0x1f2   : > { %947 = vadd.xlane.f32.xlu0 %v916_v32  ;;  %1584 = vadd.xlane.f32.xlu1 %v1568_v1  ;;  %v2599_v2 = vpop.f32.mrb[30].mxu1 }
 0x1f3   : > { %2628 = vmatprep.mubr.bf16.mxu0 %v1638_v0  ;;  %v1559_v3 = vpop.f32.mrb[31].mxu1  ;;  %v1583_v13 = vmul.f32 %v2599_v2, %v2599_v2 }
 0x1f4   : > { %v1639_v4 = vpack.c.bf16 %v2599_v2, %v1559_v3  ;;  %v1582_v19 = vmul.f32 %v1559_v3, %v1559_v3 }
 0x1f6   : > { %1586 = vadd.xlane.f32.xlu0 %v1569_v5  ;;  %1588 = vadd.xlane.f32.xlu1 %v1570_v37 }
 0x1f7   : > { %2629 = vmatmul.mubr.bf16.gmra.mrb[28].mxu0 %v1639_v4 }
 0x1fa   : > { %1590 = vadd.xlane.f32.xlu0 %v1571_v6  ;;  %1592 = vadd.xlane.f32.xlu1 %v1572_v7 }
 0x1fe   : > { %1594 = vadd.xlane.f32.xlu0 %v1573_v8  ;;  %1596 = vadd.xlane.f32.xlu1 %v1574_v36 }
 0x202   : > { %1598 = vadd.xlane.f32.xlu0 %v1575_v9  ;;  %1600 = vadd.xlane.f32.xlu1 %v1576_v10 }
 0x206   : > { %1602 = vadd.xlane.f32.xlu0 %v1577_v11  ;;  %1604 = vadd.xlane.f32.xlu1 %v1578_v12 }
 0x20a   : > { %1606 = vadd.xlane.f32.xlu0 %v1579_v14  ;;  %1608 = vadd.xlane.f32.xlu1 %v1580_v15 }
 0x20e   : > { %1610 = vadd.xlane.f32.xlu0 %v1581_v16  ;;  %1612 = vadd.xlane.f32.xlu1 %v1582_v19 }
 0x212   : > { %1614 = vadd.xlane.f32.xlu0 %v1583_v13 }
 0x224   : > { %v920_v20 = vpop.xlane.xlu0 %919 }
 0x242   : > { %v543_v25 = vpop.xlane.xlu1 %542 }
 0x243   : > { %v541_v26 = vpop.xlane.xlu0 %540  ;;  %v950_v5 = vadd.f32 %v920_v20, %v543_v25 }
 0x247   : > { %v545_v30 = vpop.xlane.xlu1 %544  ;;  %v918_v31 = vpop.xlane.xlu0 %917 }
 0x248   : > { %v949_v1 = vadd.f32 %v918_v31, %v541_v26 }
 0x24b   : > { %v922_v34 = vpop.xlane.xlu1 %921  ;;  %v547_v35 = vpop.xlane.xlu0 %546 }
 0x24c   : > { %v951_v32 = vadd.f32 %v922_v34, %v545_v30 }
 0x24f   : > { %v549_v38 = vpop.xlane.xlu1 %548  ;;  %v924_v39 = vpop.xlane.xlu0 %923 }
 0x250   : > { %v952_v2 = vadd.f32 %v924_v39, %v547_v35 }
 0x253   : > { %v926_v40 = vpop.xlane.xlu1 %925  ;;  %v551_v17 = vpop.xlane.xlu0 %550 }
 0x254   : > { %v953_v14 = vadd.f32 %v926_v40, %v549_v38 }
 0x257   : > { %v553_v41 = vpop.xlane.xlu1 %552  ;;  %v928_v42 = vpop.xlane.xlu0 %927 }
 0x258   : > { %v954_v20 = vadd.f32 %v928_v42, %v551_v17 }
 0x25b   : > { %v930_v43 = vpop.xlane.xlu1 %929  ;;  %v555_v44 = vpop.xlane.xlu0 %554 }
 0x25c   : > { %v955_v10 = vadd.f32 %v930_v43, %v553_v41 }
 0x25f   : > { %v557_v45 = vpop.xlane.xlu1 %556  ;;  %v932_v22 = vpop.xlane.xlu0 %931 }
 0x260   : > { %v956_v19 = vadd.f32 %v932_v22, %v555_v44 }
 0x263   : > { %v934_v46 = vpop.xlane.xlu1 %933  ;;  %v3512_v47 = vpop.xlane.xlu0 %558 }
 0x264   : > { %v957_v26 = vadd.f32 %v934_v46, %v557_v45 }
 0x267   : > { %v561_v48 = vpop.xlane.xlu1 %560  ;;  %v936_v21 = vpop.xlane.xlu0 %935 }
 0x268   : > { %v958_v46 = vadd.f32 %v936_v21, %v3512_v47 }
 0x26b   : > { %v938_v49 = vpop.xlane.xlu1 %937  ;;  %v563_v50 = vpop.xlane.xlu0 %562 }
 0x26c   : > { %v959_v31 = vadd.f32 %v938_v49, %v561_v48 }
 0x26f   : > { %v940_v51 = vpop.xlane.xlu0 %939  ;;  %v565_v52 = vpop.xlane.xlu1 %564 }
 0x270   : > { %v960_v35 = vadd.f32 %v940_v51, %v563_v50 }
 0x273   : > { %v3516_v53 = vpop.xlane.xlu0 %566  ;;  %v942_v29 = vpop.xlane.xlu1 %941 }
 0x274   : > { %v961_v50 = vadd.f32 %v942_v29, %v565_v52 }
 0x277   : > { %v3518_v54 = vpop.xlane.xlu0 %943  ;;  %v3520_v55 = vpop.xlane.xlu1 %568 }
 0x27b   : > { %v3522_v56 = vpop.xlane.xlu0 %570  ;;  %v946_v28 = vpop.xlane.xlu1 %945 }
 0x27f   : > { %v3524_v57 = vpop.xlane.xlu0 %947  ;;  %v1585_v58 = vpop.xlane.xlu1 %1584 }
 0x280   : > { %v3528_v37 = vadd.f32 %v1585_v58, %v949_v1  ;;  %v964_v52 = vadd.f32 %v3524_v57, %v3522_v56 }
 0x282   : > { %v1817_v9 = vmax.f32 %v3528_v37, 1e-12 }
 0x283   : > { %v1587_v59 = vpop.xlane.xlu0 %1586  ;;  %v1589_v60 = vpop.xlane.xlu1 %1588 }
 0x284   : > { %v3526_v3 = vadd.f32 %v1589_v60, %v951_v32  ;;  %v3532_v8 = vadd.f32 %v1587_v59, %v950_v5 }
 0x286   : > { %v1819_v36 = vmax.f32 %v3526_v3, 1e-12  ;;  %v1818_v15 = vmax.f32 %v3532_v8, 1e-12 }
 0x287   : > { %v1591_v61 = vpop.xlane.xlu0 %1590  ;;  %v1593_v33 = vpop.xlane.xlu1 %1592 }
 0x288   : > { %v3530_v7 = vadd.f32 %v1591_v61, %v952_v2  ;;  %2883 = vrsqrt.f32 %v1819_v36  ;;  %v3540_v25 = vadd.f32 %v1593_v33, %v953_v14  ;;  %v963_v61 = vadd.f32 %v946_v28, %v3520_v55 }
 0x289   : > { %2885 = vrsqrt.f32 %v1817_v9 }
 0x28a   : > { %v1820_v11 = vmax.f32 %v3530_v7, 1e-12  ;;  %v1821_v41 = vmax.f32 %v3540_v25, 1e-12 }
 0x28b   : > { %v1595_v62 = vpop.xlane.xlu0 %1594  ;;  %v1597_v63 = vpop.xlane.xlu1 %1596 }
 0x28c   : > { %v3538_v13 = vadd.f32 %v1597_v63, %v955_v10  ;;  %2887 = vrsqrt.f32 %v1820_v11  ;;  %v3544_v34 = vadd.f32 %v1595_v62, %v954_v20  ;;  %v962_v11 = vadd.f32 %v3518_v54, %v3516_v53 }
 0x28d   : > { %2889 = vrsqrt.f32 %v1818_v15 }
 0x28e   : > { %v1823_v38 = vmax.f32 %v3538_v13, 1e-12  ;;  %v1822_v45 = vmax.f32 %v3544_v34, 1e-12 }
 0x28f   : > { %v1599_v0 = vpop.xlane.xlu0 %1598  ;;  %v1601_v4 = vpop.xlane.xlu1 %1600 }
 0x290   : > { %v3542_v30 = vadd.f32 %v1599_v0, %v956_v19  ;;  %v3547_v39 = vadd.f32 %v1601_v4, %v957_v26  ;;  %2891 = vrsqrt.f32 %v1823_v38 }
 0x291   : > { %2893 = vrsqrt.f32 %v1821_v41 }
 0x292   : > { %v1824_v43 = vmax.f32 %v3542_v30, 1e-12  ;;  %v1825_v22 = vmax.f32 %v3547_v39, 1e-12  ;;  %v3559_v49 = vpop.eup %2883 }
 0x293   : > { %v1603_v6 = vpop.xlane.xlu0 %1602  ;;  %v1605_v12 = vpop.xlane.xlu1 %1604 }
 0x294   : > { %v3550_v17 = vadd.f32 %v1605_v12, %v959_v31  ;;  %2895 = vrsqrt.f32 %v1824_v43  ;;  %v3562_v60 = vpop.eup %2885  ;;  %v3565_v33 = vadd.f32 %v1603_v6, %v958_v46 }
 0x295   : > { %2897 = vrsqrt.f32 %v1822_v45 }
 0x296   : > { %v1827_v48 = vmax.f32 %v3550_v17, 1e-12  ;;  %v2888_v63 = vpop.eup %2887  ;;  %2899 = vrsqrt.f32 %v1825_v22  ;;  %v1826_v56 = vmax.f32 %v3565_v33, 1e-12 }
 0x297   : > { %v1607_v16 = vpop.xlane.xlu0 %1606  ;;  %v1609_v40 = vpop.xlane.xlu1 %1608 }
 0x298   : > { %v3553_v44 = vadd.f32 %v1607_v16, %v960_v35  ;;  %v3570_v29 = vadd.f32 %v1609_v40, %v961_v50  ;;  %v2890_v1 = vpop.eup %2889  ;;  %2901 = vrsqrt.f32 %v1827_v48 }
 0x29a   : > { %v1828_v51 = vmax.f32 %v3553_v44, 1e-12  ;;  %v1829_v9 = vmax.f32 %v3570_v29, 1e-12  ;;  %v3582_v14 = vpop.eup %2891 }
 0x29b   : > { %v1611_v42 = vpop.xlane.xlu0 %1610  ;;  %v1613_v58 = vpop.xlane.xlu1 %1612 }
 0x29c   : > { %v3573_v55 = vadd.f32 %v1613_v58, %v963_v61  ;;  %2903 = vrsqrt.f32 %v1828_v51  ;;  %v3585_v19 = vpop.eup %2893  ;;  %v3587_v20 = vadd.f32 %v1611_v42, %v962_v11 }
 0x29e   : > { %v1831_v12 = vmax.f32 %v3573_v55, 1e-12  ;;  %v2896_v35 = vpop.eup %2895  ;;  %v1830_v48 = vmax.f32 %v3587_v20, 1e-12 }
 0x29f   : > { %v1615_v62 = vpop.xlane.xlu0 %1614  ;;  %v2898_v38 = vpop.eup %2897 }
 0x2a0   : > { %v3575_v5 = vadd.f32 %v1615_v62, %v964_v52  ;;  %v3591_v45 = vpop.eup %2899  ;;  %v1851_v62 = vmul.f32 %v3559_v49, %v3526_v3 }
 0x2a2   : > { %v1832_v15 = vmax.f32 %v3575_v5, 1e-12  ;;  %v3593_v42 = vpop.eup %2901 }
 0x2a6   : > { %v3596_v51 = vpop.eup %2903 }
 0x2b2   : > { %v2618_v59 = vpop.f32.mrb[16].mxu0 }
 0x2b3   : > { %v1867_v47 = vmul.f32 %v3559_v49, %v2618_v59  ;;  %v1738_v21 = vpop.f32.mrb[17].mxu0 }
 0x2b4   : > { %v1865_v0 = vmul.f32 %v3562_v60, %v1738_v21  ;;  %v2619_v32 = vpop.f32.mrb[18].mxu0 }
 0x2b5   : > { %v1885_v28 = vmul.f32 1.442695, %v1867_v47  ;;  %v1868_v2 = vmul.f32 %v2888_v63, %v2619_v32  ;;  %v1741_v4 = vpop.f32.mrb[19].mxu0  ;;  %v1852_v47 = vmul.f32 %v2888_v63, %v3530_v7  ;;  %v1850_v32 = vmul.f32 %v2890_v1, %v3532_v8 }
 0x2b6   : > { %v1881_v6 = vmul.f32 1.442695, %v1865_v0  ;;  %v1866_v36 = vmul.f32 %v2890_v1, %v1741_v4  ;;  %v1849_v0 = vmul.f32 %v3562_v60, %v3528_v37 }
 0x2b7   : > { %2905 = vpow2.f32 %v1885_v28  ;;  %v1887_v57 = vmul.f32 1.442695, %v1868_v2 }
 0x2b8   : > { %2907 = vpow2.f32 %v1881_v6  ;;  %v1883_v10 = vmul.f32 1.442695, %v1866_v36 }
 0x2b9   : > { %2909 = vpow2.f32 %v1887_v57 }
 0x2ba   : > { %2911 = vpow2.f32 %v1883_v10  ;;  %v2622_v16 = vpop.f32.mrb[20].mxu0 }
 0x2bb   : > { %2913 = vrsqrt.f32 %v1826_v56  ;;  %v1871_v26 = vmul.f32 %v3582_v14, %v2622_v16  ;;  %v1754_v31 = vpop.f32.mrb[21].mxu0 }
 0x2bc   : > { %2915 = vrsqrt.f32 %v1829_v9  ;;  %v1869_v53 = vmul.f32 %v3585_v19, %v1754_v31  ;;  %v2623_v54 = vpop.f32.mrb[22].mxu0 }
 0x2bd   : > { %2917 = vrsqrt.f32 %v1831_v12  ;;  %v1893_v40 = vmul.f32 1.442695, %v1871_v26  ;;  %v1872_v41 = vmul.f32 %v2896_v35, %v2623_v54  ;;  %v1757_v43 = vpop.f32.mrb[23].mxu0  ;;  %v1855_v54 = vmul.f32 %v3582_v14, %v3538_v13 }
 0x2be   : > { %2919 = vrsqrt.f32 %v1832_v15  ;;  %v1889_v22 = vmul.f32 1.442695, %v1869_v53  ;;  %v1870_v46 = vmul.f32 %v2898_v38, %v1757_v43 }
 0x2bf   : > { %2921 = vpow2.f32 %v1893_v40  ;;  %v1895_v50 = vmul.f32 1.442695, %v1872_v41  ;;  %v1856_v40 = vmul.f32 %v2896_v35, %v3542_v30 }
 0x2c0   : > { %2923 = vpow2.f32 %v1889_v22  ;;  %v1891_v58 = vmul.f32 1.442695, %v1870_v46  ;;  %v1853_v22 = vmul.f32 %v3585_v19, %v3540_v25  ;;  %v1854_v46 = vmul.f32 %v2898_v38, %v3544_v34 }
 0x2c1   : > { %v2906_v59 = vpop.eup %2905  ;;  %2925 = vpow2.f32 %v1895_v50 }
 0x2c2   : > { %v2908_v61 = vpop.eup %2907  ;;  %2927 = vpow2.f32 %v1891_v58  ;;  %v2626_v21 = vpop.f32.mrb[24].mxu0  ;;  %v1915_v56 = vmul.f32 %v2906_v59, %v1851_v62 }
 0x2c3   : > { %v2910_v52 = vpop.eup %2909  ;;  %2929 = vrsqrt.f32 %v1830_v48  ;;  %v1875_v28 = vmul.f32 %v3593_v42, %v2626_v21  ;;  %v1770_v2 = vpop.f32.mrb[25].mxu0  ;;  %v1913_v9 = vmul.f32 %v2908_v61, %v1849_v0 }
 0x2c4   : > { %v2912_v4 = vpop.eup %2911  ;;  %v1873_v6 = vmul.f32 %v3591_v45, %v1770_v2  ;;  %v2627_v36 = vpop.f32.mrb[26].mxu0  ;;  %v1916_v3 = vmul.f32 %v2910_v52, %v1852_v47 }
 0x2c5   : > { %v2914_v49 = vpop.eup %2913  ;;  %v1901_v7 = vmul.f32 1.442695, %v1875_v28  ;;  %v1876_v63 = vmul.f32 %v3596_v51, %v2627_v36  ;;  %v1773_v57 = vpop.f32.mrb[27].mxu0  ;;  %v1914_v10 = vmul.f32 %v2912_v4, %v1850_v32  ;;  %v1859_v4 = vmul.f32 %v3593_v42, %v3550_v17 }
 0x2c6   : > { %v3607_v37 = vpop.eup %2915  ;;  %v1897_v8 = vmul.f32 1.442695, %v1873_v6  ;;  %v1874_v60 = vmul.f32 %v2914_v49, %v1773_v57  ;;  %v2718_v1 = vpack.c.bf16 %v1916_v3, %v1915_v56  ;;  %v1860_v6 = vmul.f32 %v3596_v51, %v3553_v44 }
 0x2c7   : > { %v3609_v11 = vpop.eup %2917  ;;  %2931 = vpow2.f32 %v1901_v7  ;;  %v1903_v12 = vmul.f32 1.442695, %v1876_v63  ;;  %v2715_v15 = vpack.c.bf16 %v1914_v10, %v1913_v9  ;;  %v1857_v56 = vmul.f32 %v3591_v45, %v3547_v39 }
 0x2c8   : > { %v3611_v16 = vpop.eup %2919  ;;  %2933 = vpow2.f32 %v1897_v8  ;;  %v1899_v26 = vmul.f32 1.442695, %v1874_v60  ;;  %v1858_v3 = vmul.f32 %v2914_v49, %v3565_v33  ;;  %v1930_v44 = vshrl.u32 %v232_v23, 7 }
 0x2c9   : > { %v2922_v31 = vpop.eup %2921  ;;  %2935 = vpow2.f32 %v1903_v12  ;;  %2716 = vmatpush3.bf16.msra.mxu1 %v2715_v15  ;;  %v1863_v39 = vmul.f32 %v3609_v11, %v3573_v55  ;;  %v1864_v33 = vmul.f32 %v3611_v16, %v3575_v5  ;;  %v1861_v60 = vmul.f32 %v3607_v37, %v3570_v29  ;;  %v2009_v29 = vld [vmem:[#allocation2] sm:$0xff] }
 0x2ca   : > { %v2924_v53 = vpop.eup %2923  ;;  %2937 = vpow2.f32 %v1899_v26  ;;  %v2630_v41 = vpop.f32.mrb[28].mxu0  ;;  %2717 = vmatprep.subr.bf16.mxu1 %v3050_v18  ;;  %v1919_v13 = vmul.f32 %v2922_v31, %v1855_v54  ;;  %v1933_v45 = vadd.s32 1, %v1930_v44  ;;  %v2012_v54 = vld [vmem:[#allocation2 + $0x18] sm:$0xff] }
 0x2cb   : > { %v2926_v43 = vpop.eup %2925  ;;  %v1879_v48 = vmul.f32 %v3609_v11, %v2630_v41  ;;  %v1786_v50 = vpop.f32.mrb[29].mxu0  ;;  %v1917_v21 = vmul.f32 %v2924_v53, %v1853_v22  ;;  %v1931_v11 = vmul.u32 16, %v1930_v44  ;;  %v2011_v53 = vld [vmem:[#allocation2 + $0x10] sm:$0xff] }
 0x2cc   : > { %v2928_v58 = vpop.eup %2927  ;;  %v1877_v59 = vmul.f32 %v3607_v37, %v1786_v50  ;;  %v2631_v61 = vpop.f32.mrb[30].mxu0  ;;  %v1920_v14 = vmul.f32 %v2926_v43, %v1856_v40  ;;  %v1934_v5 = vmul.u32 16, %v1933_v45  ;;  %v3052_v40 = vmov 1.0   ;;  %v2013_v43 = vld [vmem:[#allocation2 + $0x20] sm:$0xff] }
 0x2cd   : > { %v2930_v30 = vpop.eup %2929  ;;  %v1909_v35 = vmul.f32 1.442695, %v1879_v48  ;;  %v1880_v62 = vmul.f32 %v3611_v16, %v2631_v61  ;;  %v1789_v47 = vpop.f32.mrb[31].mxu0  ;;  %2719 = vmatpush3.bf16.msra.mxu1 %v2718_v1  ;;  %v1918_v52 = vmul.f32 %v2928_v58, %v1854_v46  ;;  %vm1932_vm4 = vcmp.ge.s32.totalorder %v3209_v24, %v1931_v11  ;;  %v2015_v46 = vld [vmem:[#allocation2 + $0x30] sm:$0xff]  ;;  %v2016_v48 = vld [vmem:[#allocation2 + $0x38] sm:$0xff]  ;;  %v2017_v58 = vld [vmem:[#allocation2 + $0x40] sm:$0xff] }
 0x2ce   : > { %v1905_v25 = vmul.f32 1.442695, %v1877_v59  ;;  %v1878_v19 = vmul.f32 %v2930_v30, %v1789_v47  ;;  %2720 = vmatprep.subr.bf16.mxu1 %v3050_v18  ;;  %v2724_v34 = vpack.c.bf16 %v1920_v14, %v1919_v13  ;;  %v1862_v1 = vmul.f32 %v2930_v30, %v3587_v20  ;;  %v2010_v20 = vld [vmem:[#allocation2 + $0x8] sm:$0xff]  ;;  %v2020_v13 = vld [vmem:[#allocation2 + $0x58] sm:$0xff]  ;;  %v2021_v30 = vld [vmem:[#allocation2 + $0x60] sm:$0xff] }
 0x2cf   : > { %2939 = vpow2.f32 %v1909_v35  ;;  %v1911_v38 = vmul.f32 1.442695, %v1880_v62  ;;  %v2721_v0 = vpack.c.bf16 %v1918_v52, %v1917_v21  ;;  %vm1935_vm5 = vcmp.lt.s32.totalorder %v3209_v24, %v1934_v5  ;;  %v2014_v24 = vld [vmem:[#allocation2 + $0x28] sm:$0xff]  ;;  %v2023_v47 = vld [vmem:[#allocation2 + $0x70] sm:$0xff]  ;;  %v2024_v21 = vld [vmem:[#allocation2 + $0x78] sm:$0xff] }
 0x2d0   : > { %2941 = vpow2.f32 %v1905_v25  ;;  %v1907_v32 = vmul.f32 1.442695, %v1878_v19  ;;  %vm1936_vm6 = vmand %vm1932_vm4, %vm1935_vm5  ;;  %v2739_v37 = vpack.c.bf16 %v2010_v20, %v2009_v29  ;;  %v2742_v41 = vpack.c.bf16 %v2012_v54, %v2011_v53  ;;  %v2018_v59 = vld [vmem:[#allocation2 + $0x48] sm:$0xff] }
 0x2d1   : > { %v2932_v28 = vpop.eup %2931  ;;  %2943 = vpow2.f32 %v1911_v38  ;;  %2722 = vmatpush3.bf16.msra.mxu1 %v2721_v0  ;;  %v2745_v22 = vpack.c.bf16 %v2014_v24, %v2013_v43  ;;  %v2748_v50 = vpack.c.bf16 %v2016_v48, %v2015_v46  ;;  %v2751_v61 = vpack.c.bf16 %v2018_v59, %v2017_v58  ;;  %v2022_v35 = vld [vmem:[#allocation2 + $0x68] sm:$0xff] }
 0x2d2   : > { %v2934_v2 = vpop.eup %2933  ;;  %2945 = vpow2.f32 %v1907_v32  ;;  %2723 = vmatprep.subr.bf16.mxu1 %v3050_v18  ;;  %v1923_v63 = vmul.f32 %v2932_v28, %v1859_v4  ;;  %v2757_v62 = vpack.c.bf16 %v2022_v35, %v2021_v30  ;;  %v2760_v52 = vpack.c.bf16 %v2024_v21, %v2023_v47 }
 0x2d3   : > { %v2936_v36 = vpop.eup %2935  ;;  %v1921_v9 = vmul.f32 %v2934_v2, %v1857_v56 }
 0x2d4   : > { %v2938_v7 = vpop.eup %2937  ;;  %v1924_v57 = vmul.f32 %v2936_v36, %v1860_v6 }
 0x2d5   : > { %2725 = vmatpush3.bf16.msra.mxu1 %v2724_v34  ;;  %v1922_v10 = vmul.f32 %v2938_v7, %v1858_v3 }
 0x2d6   : > { %2726 = vmatprep.subr.bf16.mxu1 %v3050_v18  ;;  %v2730_v17 = vpack.c.bf16 %v1924_v57, %v1923_v63 }
 0x2d7   : > { %v2727_v42 = vpack.c.bf16 %v1922_v10, %v1921_v9 }
 0x2d9   : > { %v2940_v51 = vpop.eup %2939  ;;  %2728 = vmatpush3.bf16.msra.mxu1 %v2727_v42 }
 0x2da   : > { %v2942_v8 = vpop.eup %2941  ;;  %2729 = vmatprep.subr.bf16.mxu1 %v3050_v18  ;;  %v1927_v12 = vmul.f32 %v2940_v51, %v1863_v39 }
 0x2db   : > { %v2944_v49 = vpop.eup %2943  ;;  %v1925_v26 = vmul.f32 %v2942_v8, %v1861_v60 }
 0x2dc   : > { %v2946_v23 = vpop.eup %2945  ;;  %v1928_v15 = vmul.f32 %v2944_v49, %v1864_v33 }
 0x2dd   : > { %2731 = vmatpush3.bf16.msra.mxu1 %v2730_v17  ;;  %v1926_v31 = vmul.f32 %v2946_v23, %v1862_v1 }
 0x2de   : > { %2732 = vmatprep.subr.bf16.mxu1 %v3050_v18  ;;  %v2736_v55 = vpack.c.bf16 %v1928_v15, %v1927_v12 }
 0x2df   : > { %v2733_v16 = vpack.c.bf16 %v1926_v31, %v1925_v26 }
 0x2e1   : > { %2734 = vmatpush3.bf16.msra.mxu1 %v2733_v16 }
 0x2e2   : > { %2735 = vmatprep.subr.bf16.mxu1 %v3050_v18 }
 0x2e5   : > { %2737 = vmatpush3.bf16.msra.mxu1 %v2736_v55 }
 0x2e6   : > { %2738 = vmatprep.subr.bf16.mxu1 %v3050_v18 }
 0x2e8   : > { %2665 = vmatmul.mubr.msk.f32.vlgmr.msra.gmra.mrb[32].mxu1 %vm1936_vm6, %v3052_v40 }
 0x2e9   : > { %2740 = vmatpush3.bf16.msra.mxu1 %v2739_v37  ;;  %2699 = vmatprep.mubr.msk.f32.mxu1 %vm3051_vm0, %v3049_v27  ;;  %v2019_v27 = vld [vmem:[#allocation2 + $0x50] sm:$0xff] }
 0x2ea   : > { %2741 = vmatprep.subr.bf16.mxu1 %v3050_v18  ;;  %v2754_v14 = vpack.c.bf16 %v2020_v13, %v2019_v27 }
 0x2ed   : > { %2743 = vmatpush3.bf16.msra.mxu1 %v2742_v41 }
 0x2ee   : > { %2744 = vmatprep.subr.bf16.mxu1 %v3050_v18 }
 0x2f1   : > { %2746 = vmatpush3.bf16.msra.mxu1 %v2745_v22 }
 0x2f2   : > { %2747 = vmatprep.subr.bf16.mxu1 %v3050_v18 }
 0x2f5   : > { %2749 = vmatpush3.bf16.msra.mxu1 %v2748_v50 }
 0x2f6   : > { %2750 = vmatprep.subr.bf16.mxu1 %v3050_v18 }
 0x2f9   : > { %2752 = vmatpush3.bf16.msra.mxu1 %v2751_v61 }
 0x2fa   : > { %2753 = vmatprep.subr.bf16.mxu1 %v3050_v18 }
 0x2fd   : > { %2755 = vmatpush3.bf16.msra.mxu1 %v2754_v14 }
 0x2fe   : > { %2756 = vmatprep.subr.bf16.mxu1 %v3050_v18 }
 0x301   : > { %2758 = vmatpush3.bf16.msra.mxu1 %v2757_v62 }
 0x302   : > { %2759 = vmatprep.subr.bf16.mxu1 %v3050_v18 }
 0x305   : > { %2761 = vmatpush3.bf16.msra.mxu1 %v2760_v52 }
 0x3bb   : > { %v2005_v25 = vpop.f32.mrb[32].mxu1 }
 0x3bc   : > { %v2666_v19 = vpop.f32.mrb[33].mxu1  ;;  %2700 = vmatmul.mubr.f32.vlgmr.msra.gmra.mrb[34].mxu1 %v2005_v25 }
 0x48f   : > { %v2091_v18 = vpop.f32.mrb[34].mxu1 }
 0x490   : > { %2095 = vst [vmem:[%s206_s8] sm:$0xff] %v2091_v18  ;;  %v2701_v34 = vpop.f32.mrb[35].mxu1 }
 0x491   : > { %2988 = shalt.err (!%p2985_p7)
}
 0x492   : > { %s2989_s28 = scalar_lea.hbm %s3663_s13, 128  ;;  %s2993_s29 = scalar_lea.hbm %s3707_s4, 256 }
 0x493   : > { %p2990_p8 = scmp.ne.s32.totalorder %s3663_s13, %s2989_s28  ;;  %p2994_p1 = scmp.lt.u32.totalorder %s3663_s13, %s3707_s4 }
 0x494   : > { %p2995_p0 = scmp.lt.u32.totalorder %s2993_s29, %s2989_s28  ;;  %p2997_p6 = scmp.lt.u32.totalorder %s2989_s28, %s3663_s13 }
 0x495   : > { %p2991_p11 = pnand %p2990_p8, %p3718_p9 }
 0x496   : > { %p2996_p5 = por %p2995_p0, %p2994_p1 }
 0x497   : > { %p2992_p13 = pneg %p2991_p11 }
 0x498   : > { %p2998_p10 = por %p2997_p6, %p2996_p5 }
 0x49a   : > { %p2999_p12 = pnand %p2998_p10, %p2992_p13 }
 0x49c   : > { %3002 = shalt.err (!%p2999_p12)
}
 0x49d   : > { %2798 = dma.vmem_to_hbm [thread:$0]  (%p3718_p9), %s3658_s9, 128, %s3663_s13, %s2097_s14  }
 0x49e PF: > { %p2810_p2 = scmp.ge.s32.totalorder %s3041_s18, 2  ;;  %s2122_s7 = sand.u32 1, %s3029_s15  }
 0x49f   : > { %p3719_p3 = scmp.ne.s32.totalorder %s3712_s26, 0  ;;  %s2123_s8 = scalar_lea.sflag [#allocation4], %s2122_s7 }
 0x4a1   : > { %p2805_p4 = pnand %p2810_p2, %p3719_p3 }
 0x4a3   : > { %3024 = dma.done.wait (!%p2805_p4), %s2123_s8, 128  }
 0x4a4   : > { %3026 = vsyncadd (!%p2805_p4), %s2123_s8, 4294967168  ;;  %p15_p7 = scmp.ge.s32.totalorder %s3104_s21, 4   ;;  %s3720_s15 = smov %s3033_s16 }
 0x4a5   : > { %s3721_s16 = smov %s3037_s17  ;;  %s3722_s17 = smov %s3115_s24 }
 0x4a6   : > { %s3723_s18 = smov %s3104_s21  ;;  %17 = sbr.rel (!%p15_p7) target bundleno = 4 (0x4), region = 76 }
 0x4ad   :  { %2128 = vsyncpa [#allocation3], 1 }
 0x4ae   :  { %2130 = vsyncpa [#allocation3 + $0x1], 1 }
 0x4af   :  { %2131 = vsyncpa [#allocation4], 1 }
 0x4b0   :  { %2133 = vsyncpa [#allocation4 + $0x1], 1 }

</bundles_post_ra>
